<compile_context>
chip_gen: v6e
topology: v6e:2x2x1
jax: 0.10.0
libtpu: 0.0.40
codegen_flags: <defaults>
</compile_context>

<pallas_src>
import jax
import jax.numpy as jnp
from jax import lax
from jax.experimental import pallas as pl
from jax.experimental.pallas import tpu as pltpu

EPS = 1e-5


def _round_up(v, m):
    return (v + m - 1) // m * m


# ---------------------------------------------------------------------------
# Fused upconv_block forward
# ---------------------------------------------------------------------------
def upconv_block_forward(x_nchw, p):
    """x_nchw: (N, Cin, H, W) float32.  Returns (N, Cout, 2H-2, 2W-2)."""
    x = x_nchw.astype(jnp.float32)
    N, Cin, H, W = x.shape
    wd, bd = p['wd'], p['bd']          # ConvTranspose2d: (Cin, Cout, 4, 4), (Cout,)
    g1, be1 = p['g1'], p['be1']        # GroupNorm(1, Cout) affine
    wc, bc = p['wc'], p['bc']          # Conv2d: (Cout, Cout, 3, 3), (Cout,)
    g2, be2 = p['g2'], p['be2']        # GroupNorm(1, Cout) affine
    Cout = wd.shape[1]
    CP = 4 * Cout                      # the 4 output phases stacked along rows

    # ---------------- flat "phase slab" geometry (all static ints) -------------
    # Activations are (rows, flat) slabs; the flat axis is (m, n) with a shared
    # row stride RSX.  Phase (py,px) of the deconv output is its own row block.
    RSX = W + 2                                   # row stride == padded input width
    LZQ = _round_up((H - 1) * RSX, 128)           # output slab, lane-dense (x128)
    LQ = LZQ + RSX + 2                            # deconv slab (covers 3x3 tap shifts)
    HXP = -(-(2 * RSX + 2 + LQ) // RSX)           # rows of the padded input slab
    LXP = HXP * RSX

    cnt_y = float(CP * H * W)                     # == Cout * (2H) * (2W)
    cnt_z = float(CP * (H - 1) * (W - 1))         # == Cout * (2H-2) * (2W-2)

    # -------- tiny XLA glue: compact 1-px zero pad of the input (no dilation) --
    xp = lax.pad(x, jnp.float32(0.0),
                 ((0, 0, 0), (0, 0, 0),
                  (1, HXP - 1 - H, 0), (1, RSX - 1 - W, 0)))
    xp = xp.reshape(N, Cin, LXP)

    # ---------------- phase-stacked weight matrices -----------------------------
    # ConvTranspose2d(4,2,1):  y[co, 2m+py, 2n+px] = bd[co] +
    #   sum_{ci,dy,dx in {0,1}} Wd[ci,co,3-py-2dy,3-px-2dx] * x_pad[ci,m+py+dy,n+px+dx]
    # All 4 phases share the 9 shifted input windows (sy,sx)=(py+dy,px+dx), so one
    # block-sparse LHS (4*Cout, 9*Cin) does the whole deconv in ONE dot.
    A1 = jnp.zeros((CP, 9 * Cin), jnp.float32)
    for py in range(2):
        for px in range(2):
            ph = 2 * py + px
            for dy in range(2):
                for dx in range(2):
                    t = (py + dy) * 3 + (px + dx)
                    blk = wd[:, :, 3 - py - 2 * dy, 3 - px - 2 * dx].T
                    A1 = A1.at[ph * Cout:(ph + 1) * Cout,
                               t * Cin:(t + 1) * Cin].set(blk.astype(jnp.float32))

    # Conv2d(3x3, valid) on the phase-stacked y:  z-phase (qy,qx), tap (dy,dx)
    # reads y-phase ((qy+dy)%2,(qx+dx)%2) shifted by ((qy+dy)//2,(qx+dx)//2).
    # The 16 distinct (source-phase, shift) windows feed one block-sparse LHS
    # (4*Cout, 16*Cout): the whole 3x3 conv is also ONE dot.
    A2 = jnp.zeros((CP, 16 * Cout), jnp.float32)
    for qy in range(2):
        for qx in range(2):
            qh = 2 * qy + qx
            for dy in range(3):
                for dx in range(3):
                    spy, sm = (qy + dy) % 2, (qy + dy) // 2
                    spx, sn = (qx + dx) % 2, (qx + dx) // 2
                    s = (2 * spy + spx) * 4 + 2 * sm + sn
                    A2 = A2.at[qh * Cout:(qh + 1) * Cout,
                               s * Cout:(s + 1) * Cout].set(
                                   wc[:, :, dy, dx].astype(jnp.float32))

    # all per-channel scalars in ONE small operand, tiled over the 4 phases
    zc = jnp.zeros_like(bd)
    prm = jnp.tile(jnp.stack([bd, g1, be1, bc, g2, be2, zc, zc], axis=1),
                   (4, 1)).astype(jnp.float32)                 # (4*Cout, 8)

    # ------------------------------- fused kernel -------------------------------
    def kernel(xp_ref, a1_ref, a2_ref, prm_ref, o_ref, r1_ref, r2_ref):
        xs = xp_ref[...]                                       # (Cin, LXP)

        # ---- transposed conv: stacked-RHS build (one copy per window) + 1 dot --
        for sy in range(3):
            for sx in range(3):
                t = sy * 3 + sx
                off = sy * RSX + sx
                r1_ref[t * Cin:(t + 1) * Cin, :] = xs[:, off:off + LQ]
        y = jnp.dot(a1_ref[...], r1_ref[...],
                    preferred_element_type=jnp.float32)        # (4*Cout, LQ)
        y = y + prm_ref[:, 0:1]                                # + bd

        # ---- GroupNorm(1,C) over all phases/channels/valid pixels + ReLU -------
        q = lax.broadcasted_iota(jnp.int32, (1, LQ), 1)
        my = ((q % RSX < W) & (q < H * RSX)).astype(jnp.float32)
        ym = y * my
        mean = jnp.sum(ym) * (1.0 / cnt_y)
        var = jnp.maximum(jnp.sum(ym * ym) * (1.0 / cnt_y) - mean * mean, 0.0)
        y = (y - mean) * lax.rsqrt(var + EPS) * prm_ref[:, 1:2] + prm_ref[:, 2:3]
        y = jnp.maximum(y, 0.0)

        # ---- 3x3 conv: stacked-RHS build (16 distinct windows) + 1 dot ---------
        for sp in range(4):
            for sm in range(2):
                for sn in range(2):
                    s = sp * 4 + 2 * sm + sn
                    off = sm * RSX + sn
                    r2_ref[s * Cout:(s + 1) * Cout, :] = \
                        y[sp * Cout:(sp + 1) * Cout, off:off + LZQ]
        z = jnp.dot(a2_ref[...], r2_ref[...],
                    preferred_element_type=jnp.float32)        # (4*Cout, LZQ)
        z = z + prm_ref[:, 3:4]                                # + bc

        # ---- GroupNorm(1,C) + ReLU ----------------------------------------------
        r = lax.broadcasted_iota(jnp.int32, (1, LZQ), 1)
        mz = ((r % RSX < (W - 1)) & (r < (H - 1) * RSX)).astype(jnp.float32)
        zm = z * mz
        mean2 = jnp.sum(zm) * (1.0 / cnt_z)
        var2 = jnp.maximum(jnp.sum(zm * zm) * (1.0 / cnt_z) - mean2 * mean2, 0.0)
        z = (z - mean2) * lax.rsqrt(var2 + EPS) * prm_ref[:, 4:5] + prm_ref[:, 5:6]
        o_ref[...] = jnp.maximum(z, 0.0)

    rep = lambda shape: pl.BlockSpec(shape, lambda n: (0, 0))

    out = pl.pallas_call(
        kernel,
        out_shape=jax.ShapeDtypeStruct((N, CP, LZQ), jnp.float32),
        grid=(N,),
        in_specs=[
            pl.BlockSpec((None, Cin, LXP), lambda n: (n, 0, 0)),   # padded input
            rep((CP, 9 * Cin)),                                    # deconv phase LHS
            rep((CP, 16 * Cout)),                                  # conv   phase LHS
            rep((CP, 8)),                                          # packed scalars
        ],
        out_specs=pl.BlockSpec((None, CP, LZQ), lambda n: (n, 0, 0)),
        scratch_shapes=[pltpu.VMEM((9 * Cin, LQ), jnp.float32),     # stacked RHS #1
                        pltpu.VMEM((16 * Cout, LZQ), jnp.float32)], # stacked RHS #2
        compiler_params=pltpu.CompilerParams(
            dimension_semantics=("parallel",),
            vmem_limit_bytes=32 * 1024 * 1024),
    )(xp, A1, A2, prm)

    # ---- tiny XLA glue: de-interleave the 4 output phases (pixel-shuffle) ------
    zph = out.reshape(N, 2, 2, Cout, LZQ)[:, :, :, :, :(H - 1) * RSX]
    zph = zph.reshape(N, 2, 2, Cout, H - 1, RSX)[..., :W - 1]   # (N,2,2,C,H-1,W-1)
    z = jnp.transpose(zph, (0, 3, 4, 1, 5, 2))                  # (N,C,a,qy,b,qx)
    return z.reshape(N, Cout, 2 * (H - 1), 2 * (W - 1))


# ---------------------------------------------------------------------------
# Deterministic synthetic parameters
# ---------------------------------------------------------------------------
def init_params(key, in_nc, out_nc):
    ks = jax.random.split(key, 8)
    s_d = 1.0 / float((in_nc * 16) ** 0.5)
    s_c = 1.0 / float((out_nc * 9) ** 0.5)
    return dict(
        wd=jax.random.uniform(ks[0], (in_nc, out_nc, 4, 4), jnp.float32, -s_d, s_d),
        bd=jax.random.uniform(ks[1], (out_nc,), jnp.float32, -s_d, s_d),
        wc=jax.random.uniform(ks[2], (out_nc, out_nc, 3, 3), jnp.float32, -s_c, s_c),
        bc=jax.random.uniform(ks[3], (out_nc,), jnp.float32, -s_c, s_c),
        g1=1.0 + 0.1 * jax.random.normal(ks[4], (out_nc,), jnp.float32),
        be1=0.1 * jax.random.normal(ks[5], (out_nc,), jnp.float32),
        g2=1.0 + 0.1 * jax.random.normal(ks[6], (out_nc,), jnp.float32),
        be2=0.1 * jax.random.normal(ks[7], (out_nc,), jnp.float32),
    )


# ---------------------------------------------------------------------------
# Pure-JAX reference (correctness check only)
# ---------------------------------------------------------------------------
def _ref_forward(x_nchw, p):
    x = x_nchw.astype(jnp.float32)
    dn = ('NCHW', 'OIHW', 'NCHW')

    def gn(t, g, b):
        m = jnp.mean(t, axis=(1, 2, 3), keepdims=True)
        v = jnp.mean((t - m) ** 2, axis=(1, 2, 3), keepdims=True)
        return (t - m) * lax.rsqrt(v + 1e-5) * g[None, :, None, None] \
            + b[None, :, None, None]

    # ConvTranspose2d(in,out,4,2,1) == lhs-dilated conv with flipped kernel
    wd_oihw = jnp.transpose(p['wd'][:, :, ::-1, ::-1], (1, 0, 2, 3))
    y = lax.conv_general_dilated(x, wd_oihw, (1, 1), ((2, 2), (2, 2)),
                                 lhs_dilation=(2, 2), dimension_numbers=dn,
                                 precision=lax.Precision.HIGHEST)
    y = y + p['bd'][None, :, None, None]
    y = jax.nn.relu(gn(y, p['g1'], p['be1']))

    z = lax.conv_general_dilated(y, p['wc'], (1, 1), ((0, 0), (0, 0)),
                                 dimension_numbers=dn,
                                 precision=lax.Precision.HIGHEST)
    z = z + p['bc'][None, :, None, None]
    z = jax.nn.relu(gn(z, p['g2'], p['be2']))
    return z


if __name__ == "__main__":
    in_nc, out_nc = 4, 8
    N, H, W = 2, 16, 16

    key = jax.random.PRNGKey(0)
    kx, kp = jax.random.split(key)
    x = jax.random.normal(kx, (N, in_nc, H, W), jnp.float32)   # NCHW, like PyTorch
    params = init_params(kp, in_nc, out_nc)

    fwd = jax.jit(upconv_block_forward)
    out = jax.block_until_ready(fwd(x, params))
    assert out.shape == (N, out_nc, 2 * H - 2, 2 * W - 2), out.shape

    ref = jax.block_until_ready(_ref_forward(x, params))
    max_err = float(jnp.max(jnp.abs(out - ref)))
    assert max_err < 1e-2, f"max abs err vs reference: {max_err}"

    print("KERNEL_OK")
</pallas_src>

<mosaic_0001>
module attributes {stable_mosaic.version = 11 : i64} {
  func.func @kernel(%arg0: i32, %arg1: memref<1x4x450xf32, #tpu.memory_space<vmem>>, %arg2: memref<32x36xf32, #tpu.memory_space<vmem>>, %arg3: memref<32x128xf32, #tpu.memory_space<vmem>>, %arg4: memref<32x8xf32, #tpu.memory_space<vmem>>, %arg5: memref<1x32x384xf32, #tpu.memory_space<vmem>>, %arg6: memref<36x404xf32, #tpu.memory_space<vmem>>, %arg7: memref<128x384xf32, #tpu.memory_space<vmem>>) attributes {dimension_semantics = [#tpu.dimension_semantics<parallel>], iteration_bounds = array<i64: 2>, scalar_prefetch = 0 : i64, scratch_operands = 2 : i64, tpu.core_type = #tpu.core_type<tc>, window_params = [{transform_indices = @transform_0, window_bounds = array<i64: 1, 4, 450>}, {pipeline_mode = #tpu.pipeline_mode<synchronous>, transform_indices = @transform_1, window_bounds = array<i64: 32, 36>}, {pipeline_mode = #tpu.pipeline_mode<synchronous>, transform_indices = @transform_2, window_bounds = array<i64: 32, 128>}, {pipeline_mode = #tpu.pipeline_mode<synchronous>, transform_indices = @transform_3, window_bounds = array<i64: 32, 8>}, {transform_indices = @transform_4, window_bounds = array<i64: 1, 32, 384>}]} {
    %c0 = arith.constant 0 : index
    %c0_0 = arith.constant 0 : index
    %c0_1 = arith.constant 0 : index
    %0 = vector.load %arg1[%c0, %c0_0, %c0_1] : memref<1x4x450xf32, #tpu.memory_space<vmem>>, vector<1x4x450xf32>
    %1 = vector.shape_cast %0 : vector<1x4x450xf32> to vector<4x450xf32>
    %2 = vector.extract_strided_slice %1 {offsets = [0, 0], sizes = [4, 404], strides = [1, 1]} : vector<4x450xf32> to vector<4x404xf32>
    %c0_2 = arith.constant 0 : index
    %c0_3 = arith.constant 0 : index
    %3 = vector.load %arg6[%c0_2, %c0_3] : memref<36x404xf32, #tpu.memory_space<vmem>>, vector<4x404xf32>
    tpu.vector_store %arg6[%c0_2, %c0_3], %2 {strides = array<i32>} : memref<36x404xf32, #tpu.memory_space<vmem>>, vector<4x404xf32>,
    %4 = vector.extract_strided_slice %1 {offsets = [0, 1], sizes = [4, 404], strides = [1, 1]} : vector<4x450xf32> to vector<4x404xf32>
    %c4 = arith.constant 4 : index
    %c0_4 = arith.constant 0 : index
    %5 = vector.load %arg6[%c4, %c0_4] : memref<36x404xf32, #tpu.memory_space<vmem>>, vector<4x404xf32>
    tpu.vector_store %arg6[%c4, %c0_4], %4 {strides = array<i32>} : memref<36x404xf32, #tpu.memory_space<vmem>>, vector<4x404xf32>,
    %6 = vector.extract_strided_slice %1 {offsets = [0, 2], sizes = [4, 404], strides = [1, 1]} : vector<4x450xf32> to vector<4x404xf32>
    %c8 = arith.constant 8 : index
    %c0_5 = arith.constant 0 : index
    %7 = vector.load %arg6[%c8, %c0_5] : memref<36x404xf32, #tpu.memory_space<vmem>>, vector<4x404xf32>
    tpu.vector_store %arg6[%c8, %c0_5], %6 {strides = array<i32>} : memref<36x404xf32, #tpu.memory_space<vmem>>, vector<4x404xf32>,
    %8 = vector.extract_strided_slice %1 {offsets = [0, 18], sizes = [4, 404], strides = [1, 1]} : vector<4x450xf32> to vector<4x404xf32>
    %c12 = arith.constant 12 : index
    %c0_6 = arith.constant 0 : index
    %9 = vector.load %arg6[%c12, %c0_6] : memref<36x404xf32, #tpu.memory_space<vmem>>, vector<4x404xf32>
    tpu.vector_store %arg6[%c12, %c0_6], %8 {strides = array<i32>} : memref<36x404xf32, #tpu.memory_space<vmem>>, vector<4x404xf32>,
    %10 = vector.extract_strided_slice %1 {offsets = [0, 19], sizes = [4, 404], strides = [1, 1]} : vector<4x450xf32> to vector<4x404xf32>
    %c16 = arith.constant 16 : index
    %c0_7 = arith.constant 0 : index
    %11 = vector.load %arg6[%c16, %c0_7] : memref<36x404xf32, #tpu.memory_space<vmem>>, vector<4x404xf32>
    tpu.vector_store %arg6[%c16, %c0_7], %10 {strides = array<i32>} : memref<36x404xf32, #tpu.memory_space<vmem>>, vector<4x404xf32>,
    %12 = vector.extract_strided_slice %1 {offsets = [0, 20], sizes = [4, 404], strides = [1, 1]} : vector<4x450xf32> to vector<4x404xf32>
    %c20 = arith.constant 20 : index
    %c0_8 = arith.constant 0 : index
    %13 = vector.load %arg6[%c20, %c0_8] : memref<36x404xf32, #tpu.memory_space<vmem>>, vector<4x404xf32>
    tpu.vector_store %arg6[%c20, %c0_8], %12 {strides = array<i32>} : memref<36x404xf32, #tpu.memory_space<vmem>>, vector<4x404xf32>,
    %14 = vector.extract_strided_slice %1 {offsets = [0, 36], sizes = [4, 404], strides = [1, 1]} : vector<4x450xf32> to vector<4x404xf32>
    %c24 = arith.constant 24 : index
    %c0_9 = arith.constant 0 : index
    %15 = vector.load %arg6[%c24, %c0_9] : memref<36x404xf32, #tpu.memory_space<vmem>>, vector<4x404xf32>
    tpu.vector_store %arg6[%c24, %c0_9], %14 {strides = array<i32>} : memref<36x404xf32, #tpu.memory_space<vmem>>, vector<4x404xf32>,
    %16 = vector.extract_strided_slice %1 {offsets = [0, 37], sizes = [4, 404], strides = [1, 1]} : vector<4x450xf32> to vector<4x404xf32>
    %c28 = arith.constant 28 : index
    %c0_10 = arith.constant 0 : index
    %17 = vector.load %arg6[%c28, %c0_10] : memref<36x404xf32, #tpu.memory_space<vmem>>, vector<4x404xf32>
    tpu.vector_store %arg6[%c28, %c0_10], %16 {strides = array<i32>} : memref<36x404xf32, #tpu.memory_space<vmem>>, vector<4x404xf32>,
    %18 = vector.extract_strided_slice %1 {offsets = [0, 38], sizes = [4, 404], strides = [1, 1]} : vector<4x450xf32> to vector<4x404xf32>
    %c32 = arith.constant 32 : index
    %c0_11 = arith.constant 0 : index
    %19 = vector.load %arg6[%c32, %c0_11] : memref<36x404xf32, #tpu.memory_space<vmem>>, vector<4x404xf32>
    tpu.vector_store %arg6[%c32, %c0_11], %18 {strides = array<i32>} : memref<36x404xf32, #tpu.memory_space<vmem>>, vector<4x404xf32>,
    %c0_12 = arith.constant 0 : index
    %c0_13 = arith.constant 0 : index
    %20 = vector.load %arg2[%c0_12, %c0_13] : memref<32x36xf32, #tpu.memory_space<vmem>>, vector<32x36xf32>
    %c0_14 = arith.constant 0 : index
    %c0_15 = arith.constant 0 : index
    %21 = vector.load %arg6[%c0_14, %c0_15] : memref<36x404xf32, #tpu.memory_space<vmem>>, vector<36x404xf32>
    %cst = arith.constant dense<0.000000e+00> : vector<32x404xf32>
    %22 = tpu.matmul %20, %21, %cst {dimension_numbers = #tpu.dot_dimension_numbers<[1], [0], [0], [1], [0, 0, 1, 1], [], []>} : vector<32x36xf32>, vector<36x404xf32>, vector<32x404xf32> -> vector<32x404xf32>
    %c0_16 = arith.constant 0 : index
    %c0_17 = arith.constant 0 : index
    %23 = vector.load %arg4[%c0_16, %c0_17] : memref<32x8xf32, #tpu.memory_space<vmem>>, vector<32x1xf32>
    %24 = vector.broadcast %23 : vector<32x1xf32> to vector<32x404xf32>
    %25 = arith.addf %22, %24 : vector<32x404xf32>
    %26 = tpu.iota {dimensions = array<i32: 1>} : vector<1x404xi32>
    %c18_i32 = arith.constant 18 : i32
    %c0_i32 = arith.constant 0 : i32
    %27 = arith.cmpi eq, %c18_i32, %c0_i32 : i32
    %c1_i32 = arith.constant 1 : i32
    %28 = arith.select %27, %c1_i32, %c18_i32 : i32
    %29 = vector.broadcast %28 : i32 to vector<1x404xi32>
    %30 = arith.remsi %26, %29 : vector<1x404xi32>
    %c0_i32_18 = arith.constant 0 : i32
    %31 = vector.broadcast %c0_i32_18 : i32 to vector<1x404xi32>
    %32 = arith.cmpi ne, %30, %31 : vector<1x404xi32>
    %c0_i32_19 = arith.constant 0 : i32
    %33 = vector.broadcast %c0_i32_19 : i32 to vector<1x404xi32>
    %34 = arith.cmpi slt, %30, %33 : vector<1x404xi32>
    %c0_i32_20 = arith.constant 0 : i32
    %35 = arith.cmpi slt, %28, %c0_i32_20 : i32
    %36 = vector.broadcast %35 : i1 to vector<1x404xi1>
    %37 = vector.broadcast %36 : vector<1x404xi1> to vector<1x404xi1>
    %38 = arith.xori %34, %37 : vector<1x404xi1>
    %39 = arith.andi %38, %32 : vector<1x404xi1>
    %40 = vector.broadcast %28 : i32 to vector<1x404xi32>
    %41 = arith.addi %30, %40 : vector<1x404xi32>
    %42 = arith.select %39, %41, %30 : vector<1x404xi1>, vector<1x404xi32>
    %c16_i32 = arith.constant 16 : i32
    %43 = vector.broadcast %c16_i32 : i32 to vector<1x404xi32>
    %44 = arith.cmpi slt, %42, %43 : vector<1x404xi32>
    %c288_i32 = arith.constant 288 : i32
    %45 = vector.broadcast %c288_i32 : i32 to vector<1x404xi32>
    %46 = arith.cmpi slt, %26, %45 : vector<1x404xi32>
    %47 = arith.andi %44, %46 : vector<1x404xi1>
    %48 = arith.extui %47 : vector<1x404xi1> to vector<1x404xi32>
    %49 = arith.sitofp %48 : vector<1x404xi32> to vector<1x404xf32>
    %50 = vector.broadcast %49 : vector<1x404xf32> to vector<32x404xf32>
    %51 = arith.mulf %25, %50 : vector<32x404xf32>
    %52 = vector.shape_cast %51 : vector<32x404xf32> to vector<1x32x404xf32>
    %cst_21 = arith.constant dense<0.000000e+00> : vector<1xf32>
    %53 = vector.multi_reduction <add>, %52, %cst_21 [1, 2] : vector<1x32x404xf32> to vector<1xf32>
    %54 = vector.shape_cast %53 : vector<1xf32> to vector<1x1x1xf32>
    %55 = vector.extract %54[0, 0, 0] : f32 from vector<1x1x1xf32>
    %cst_22 = arith.constant 1.22070313E-4 : f32
    %56 = arith.mulf %55, %cst_22 : f32
    %57 = arith.mulf %51, %51 : vector<32x404xf32>
    %58 = vector.shape_cast %57 : vector<32x404xf32> to vector<1x32x404xf32>
    %cst_23 = arith.constant dense<0.000000e+00> : vector<1xf32>
    %59 = vector.multi_reduction <add>, %58, %cst_23 [1, 2] : vector<1x32x404xf32> to vector<1xf32>
    %60 = vector.shape_cast %59 : vector<1xf32> to vector<1x1x1xf32>
    %61 = vector.extract %60[0, 0, 0] : f32 from vector<1x1x1xf32>
    %cst_24 = arith.constant 1.22070313E-4 : f32
    %62 = arith.mulf %61, %cst_24 : f32
    %63 = arith.mulf %56, %56 : f32
    %64 = arith.subf %62, %63 : f32
    %cst_25 = arith.constant 0.000000e+00 : f32
    %65 = arith.maximumf %64, %cst_25 : f32
    %66 = vector.broadcast %56 : f32 to vector<32x404xf32>
    %67 = arith.subf %25, %66 : vector<32x404xf32>
    %cst_26 = arith.constant 9.99999974E-6 : f32
    %68 = arith.addf %65, %cst_26 : f32
    %69 = math.rsqrt %68 : f32
    %70 = vector.broadcast %69 : f32 to vector<32x404xf32>
    %71 = arith.mulf %67, %70 : vector<32x404xf32>
    %c0_27 = arith.constant 0 : index
    %c1 = arith.constant 1 : index
    %72 = vector.load %arg4[%c0_27, %c1] : memref<32x8xf32, #tpu.memory_space<vmem>>, vector<32x1xf32>
    %73 = vector.broadcast %72 : vector<32x1xf32> to vector<32x404xf32>
    %74 = arith.mulf %71, %73 : vector<32x404xf32>
    %c0_28 = arith.constant 0 : index
    %c2 = arith.constant 2 : index
    %75 = vector.load %arg4[%c0_28, %c2] : memref<32x8xf32, #tpu.memory_space<vmem>>, vector<32x1xf32>
    %76 = vector.broadcast %75 : vector<32x1xf32> to vector<32x404xf32>
    %77 = arith.addf %74, %76 : vector<32x404xf32>
    %cst_29 = arith.constant 0.000000e+00 : f32
    %78 = vector.broadcast %cst_29 : f32 to vector<32x404xf32>
    %79 = arith.maximumf %77, %78 : vector<32x404xf32>
    %80 = vector.extract_strided_slice %79 {offsets = [0, 0], sizes = [8, 384], strides = [1, 1]} : vector<32x404xf32> to vector<8x384xf32>
    %c0_30 = arith.constant 0 : index
    %c0_31 = arith.constant 0 : index
    %81 = vector.load %arg7[%c0_30, %c0_31] : memref<128x384xf32, #tpu.memory_space<vmem>>, vector<8x384xf32>
    tpu.vector_store %arg7[%c0_30, %c0_31], %80 {strides = array<i32>} : memref<128x384xf32, #tpu.memory_space<vmem>>, vector<8x384xf32>,
    %82 = vector.extract_strided_slice %79 {offsets = [0, 1], sizes = [8, 384], strides = [1, 1]} : vector<32x404xf32> to vector<8x384xf32>
    %c8_32 = arith.constant 8 : index
    %c0_33 = arith.constant 0 : index
    %83 = vector.load %arg7[%c8_32, %c0_33] : memref<128x384xf32, #tpu.memory_space<vmem>>, vector<8x384xf32>
    tpu.vector_store %arg7[%c8_32, %c0_33], %82 {strides = array<i32>} : memref<128x384xf32, #tpu.memory_space<vmem>>, vector<8x384xf32>,
    %84 = vector.extract_strided_slice %79 {offsets = [0, 18], sizes = [8, 384], strides = [1, 1]} : vector<32x404xf32> to vector<8x384xf32>
    %c16_34 = arith.constant 16 : index
    %c0_35 = arith.constant 0 : index
    %85 = vector.load %arg7[%c16_34, %c0_35] : memref<128x384xf32, #tpu.memory_space<vmem>>, vector<8x384xf32>
    tpu.vector_store %arg7[%c16_34, %c0_35], %84 {strides = array<i32>} : memref<128x384xf32, #tpu.memory_space<vmem>>, vector<8x384xf32>,
    %86 = vector.extract_strided_slice %79 {offsets = [0, 19], sizes = [8, 384], strides = [1, 1]} : vector<32x404xf32> to vector<8x384xf32>
    %c24_36 = arith.constant 24 : index
    %c0_37 = arith.constant 0 : index
    %87 = vector.load %arg7[%c24_36, %c0_37] : memref<128x384xf32, #tpu.memory_space<vmem>>, vector<8x384xf32>
    tpu.vector_store %arg7[%c24_36, %c0_37], %86 {strides = array<i32>} : memref<128x384xf32, #tpu.memory_space<vmem>>, vector<8x384xf32>,
    %88 = vector.extract_strided_slice %79 {offsets = [8, 0], sizes = [8, 384], strides = [1, 1]} : vector<32x404xf32> to vector<8x384xf32>
    %c32_38 = arith.constant 32 : index
    %c0_39 = arith.constant 0 : index
    %89 = vector.load %arg7[%c32_38, %c0_39] : memref<128x384xf32, #tpu.memory_space<vmem>>, vector<8x384xf32>
    tpu.vector_store %arg7[%c32_38, %c0_39], %88 {strides = array<i32>} : memref<128x384xf32, #tpu.memory_space<vmem>>, vector<8x384xf32>,
    %90 = vector.extract_strided_slice %79 {offsets = [8, 1], sizes = [8, 384], strides = [1, 1]} : vector<32x404xf32> to vector<8x384xf32>
    %c40 = arith.constant 40 : index
    %c0_40 = arith.constant 0 : index
    %91 = vector.load %arg7[%c40, %c0_40] : memref<128x384xf32, #tpu.memory_space<vmem>>, vector<8x384xf32>
    tpu.vector_store %arg7[%c40, %c0_40], %90 {strides = array<i32>} : memref<128x384xf32, #tpu.memory_space<vmem>>, vector<8x384xf32>,
    %92 = vector.extract_strided_slice %79 {offsets = [8, 18], sizes = [8, 384], strides = [1, 1]} : vector<32x404xf32> to vector<8x384xf32>
    %c48 = arith.constant 48 : index
    %c0_41 = arith.constant 0 : index
    %93 = vector.load %arg7[%c48, %c0_41] : memref<128x384xf32, #tpu.memory_space<vmem>>, vector<8x384xf32>
    tpu.vector_store %arg7[%c48, %c0_41], %92 {strides = array<i32>} : memref<128x384xf32, #tpu.memory_space<vmem>>, vector<8x384xf32>,
    %94 = vector.extract_strided_slice %79 {offsets = [8, 19], sizes = [8, 384], strides = [1, 1]} : vector<32x404xf32> to vector<8x384xf32>
    %c56 = arith.constant 56 : index
    %c0_42 = arith.constant 0 : index
    %95 = vector.load %arg7[%c56, %c0_42] : memref<128x384xf32, #tpu.memory_space<vmem>>, vector<8x384xf32>
    tpu.vector_store %arg7[%c56, %c0_42], %94 {strides = array<i32>} : memref<128x384xf32, #tpu.memory_space<vmem>>, vector<8x384xf32>,
    %96 = vector.extract_strided_slice %79 {offsets = [16, 0], sizes = [8, 384], strides = [1, 1]} : vector<32x404xf32> to vector<8x384xf32>
    %c64 = arith.constant 64 : index
    %c0_43 = arith.constant 0 : index
    %97 = vector.load %arg7[%c64, %c0_43] : memref<128x384xf32, #tpu.memory_space<vmem>>, vector<8x384xf32>
    tpu.vector_store %arg7[%c64, %c0_43], %96 {strides = array<i32>} : memref<128x384xf32, #tpu.memory_space<vmem>>, vector<8x384xf32>,
    %98 = vector.extract_strided_slice %79 {offsets = [16, 1], sizes = [8, 384], strides = [1, 1]} : vector<32x404xf32> to vector<8x384xf32>
    %c72 = arith.constant 72 : index
    %c0_44 = arith.constant 0 : index
    %99 = vector.load %arg7[%c72, %c0_44] : memref<128x384xf32, #tpu.memory_space<vmem>>, vector<8x384xf32>
    tpu.vector_store %arg7[%c72, %c0_44], %98 {strides = array<i32>} : memref<128x384xf32, #tpu.memory_space<vmem>>, vector<8x384xf32>,
    %100 = vector.extract_strided_slice %79 {offsets = [16, 18], sizes = [8, 384], strides = [1, 1]} : vector<32x404xf32> to vector<8x384xf32>
    %c80 = arith.constant 80 : index
    %c0_45 = arith.constant 0 : index
    %101 = vector.load %arg7[%c80, %c0_45] : memref<128x384xf32, #tpu.memory_space<vmem>>, vector<8x384xf32>
    tpu.vector_store %arg7[%c80, %c0_45], %100 {strides = array<i32>} : memref<128x384xf32, #tpu.memory_space<vmem>>, vector<8x384xf32>,
    %102 = vector.extract_strided_slice %79 {offsets = [16, 19], sizes = [8, 384], strides = [1, 1]} : vector<32x404xf32> to vector<8x384xf32>
    %c88 = arith.constant 88 : index
    %c0_46 = arith.constant 0 : index
    %103 = vector.load %arg7[%c88, %c0_46] : memref<128x384xf32, #tpu.memory_space<vmem>>, vector<8x384xf32>
    tpu.vector_store %arg7[%c88, %c0_46], %102 {strides = array<i32>} : memref<128x384xf32, #tpu.memory_space<vmem>>, vector<8x384xf32>,
    %104 = vector.extract_strided_slice %79 {offsets = [24, 0], sizes = [8, 384], strides = [1, 1]} : vector<32x404xf32> to vector<8x384xf32>
    %c96 = arith.constant 96 : index
    %c0_47 = arith.constant 0 : index
    %105 = vector.load %arg7[%c96, %c0_47] : memref<128x384xf32, #tpu.memory_space<vmem>>, vector<8x384xf32>
    tpu.vector_store %arg7[%c96, %c0_47], %104 {strides = array<i32>} : memref<128x384xf32, #tpu.memory_space<vmem>>, vector<8x384xf32>,
    %106 = vector.extract_strided_slice %79 {offsets = [24, 1], sizes = [8, 384], strides = [1, 1]} : vector<32x404xf32> to vector<8x384xf32>
    %c104 = arith.constant 104 : index
    %c0_48 = arith.constant 0 : index
    %107 = vector.load %arg7[%c104, %c0_48] : memref<128x384xf32, #tpu.memory_space<vmem>>, vector<8x384xf32>
    tpu.vector_store %arg7[%c104, %c0_48], %106 {strides = array<i32>} : memref<128x384xf32, #tpu.memory_space<vmem>>, vector<8x384xf32>,
    %108 = vector.extract_strided_slice %79 {offsets = [24, 18], sizes = [8, 384], strides = [1, 1]} : vector<32x404xf32> to vector<8x384xf32>
    %c112 = arith.constant 112 : index
    %c0_49 = arith.constant 0 : index
    %109 = vector.load %arg7[%c112, %c0_49] : memref<128x384xf32, #tpu.memory_space<vmem>>, vector<8x384xf32>
    tpu.vector_store %arg7[%c112, %c0_49], %108 {strides = array<i32>} : memref<128x384xf32, #tpu.memory_space<vmem>>, vector<8x384xf32>,
    %110 = vector.extract_strided_slice %79 {offsets = [24, 19], sizes = [8, 384], strides = [1, 1]} : vector<32x404xf32> to vector<8x384xf32>
    %c120 = arith.constant 120 : index
    %c0_50 = arith.constant 0 : index
    %111 = vector.load %arg7[%c120, %c0_50] : memref<128x384xf32, #tpu.memory_space<vmem>>, vector<8x384xf32>
    tpu.vector_store %arg7[%c120, %c0_50], %110 {strides = array<i32>} : memref<128x384xf32, #tpu.memory_space<vmem>>, vector<8x384xf32>,
    %c0_51 = arith.constant 0 : index
    %c0_52 = arith.constant 0 : index
    %112 = vector.load %arg3[%c0_51, %c0_52] : memref<32x128xf32, #tpu.memory_space<vmem>>, vector<32x128xf32>
    %c0_53 = arith.constant 0 : index
    %c0_54 = arith.constant 0 : index
    %113 = vector.load %arg7[%c0_53, %c0_54] : memref<128x384xf32, #tpu.memory_space<vmem>>, vector<128x384xf32>
    %cst_55 = arith.constant dense<0.000000e+00> : vector<32x384xf32>
    %114 = tpu.matmul %112, %113, %cst_55 {dimension_numbers = #tpu.dot_dimension_numbers<[1], [0], [0], [1], [0, 0, 1, 1], [], []>} : vector<32x128xf32>, vector<128x384xf32>, vector<32x384xf32> -> vector<32x384xf32>
    %c0_56 = arith.constant 0 : index
    %c3 = arith.constant 3 : index
    %115 = vector.load %arg4[%c0_56, %c3] : memref<32x8xf32, #tpu.memory_space<vmem>>, vector<32x1xf32>
    %116 = vector.broadcast %115 : vector<32x1xf32> to vector<32x384xf32>
    %117 = arith.addf %114, %116 : vector<32x384xf32>
    %118 = tpu.iota {dimensions = array<i32: 1>} : vector<1x384xi32>
    %c18_i32_57 = arith.constant 18 : i32
    %c0_i32_58 = arith.constant 0 : i32
    %119 = arith.cmpi eq, %c18_i32_57, %c0_i32_58 : i32
    %c1_i32_59 = arith.constant 1 : i32
    %120 = arith.select %119, %c1_i32_59, %c18_i32_57 : i32
    %121 = vector.broadcast %120 : i32 to vector<1x384xi32>
    %122 = arith.remsi %118, %121 : vector<1x384xi32>
    %c0_i32_60 = arith.constant 0 : i32
    %123 = vector.broadcast %c0_i32_60 : i32 to vector<1x384xi32>
    %124 = arith.cmpi ne, %122, %123 : vector<1x384xi32>
    %c0_i32_61 = arith.constant 0 : i32
    %125 = vector.broadcast %c0_i32_61 : i32 to vector<1x384xi32>
    %126 = arith.cmpi slt, %122, %125 : vector<1x384xi32>
    %c0_i32_62 = arith.constant 0 : i32
    %127 = arith.cmpi slt, %120, %c0_i32_62 : i32
    %128 = vector.broadcast %127 : i1 to vector<1x384xi1>
    %129 = vector.broadcast %128 : vector<1x384xi1> to vector<1x384xi1>
    %130 = arith.xori %126, %129 : vector<1x384xi1>
    %131 = arith.andi %130, %124 : vector<1x384xi1>
    %132 = vector.broadcast %120 : i32 to vector<1x384xi32>
    %133 = arith.addi %122, %132 : vector<1x384xi32>
    %134 = arith.select %131, %133, %122 : vector<1x384xi1>, vector<1x384xi32>
    %c15_i32 = arith.constant 15 : i32
    %135 = vector.broadcast %c15_i32 : i32 to vector<1x384xi32>
    %136 = arith.cmpi slt, %134, %135 : vector<1x384xi32>
    %c270_i32 = arith.constant 270 : i32
    %137 = vector.broadcast %c270_i32 : i32 to vector<1x384xi32>
    %138 = arith.cmpi slt, %118, %137 : vector<1x384xi32>
    %139 = arith.andi %136, %138 : vector<1x384xi1>
    %140 = arith.extui %139 : vector<1x384xi1> to vector<1x384xi32>
    %141 = arith.sitofp %140 : vector<1x384xi32> to vector<1x384xf32>
    %142 = vector.broadcast %141 : vector<1x384xf32> to vector<32x384xf32>
    %143 = arith.mulf %117, %142 : vector<32x384xf32>
    %144 = vector.shape_cast %143 : vector<32x384xf32> to vector<1x32x384xf32>
    %cst_63 = arith.constant dense<0.000000e+00> : vector<1xf32>
    %145 = vector.multi_reduction <add>, %144, %cst_63 [1, 2] : vector<1x32x384xf32> to vector<1xf32>
    %146 = vector.shape_cast %145 : vector<1xf32> to vector<1x1x1xf32>
    %147 = vector.extract %146[0, 0, 0] : f32 from vector<1x1x1xf32>
    %cst_64 = arith.constant 1.38888892E-4 : f32
    %148 = arith.mulf %147, %cst_64 : f32
    %149 = arith.mulf %143, %143 : vector<32x384xf32>
    %150 = vector.shape_cast %149 : vector<32x384xf32> to vector<1x32x384xf32>
    %cst_65 = arith.constant dense<0.000000e+00> : vector<1xf32>
    %151 = vector.multi_reduction <add>, %150, %cst_65 [1, 2] : vector<1x32x384xf32> to vector<1xf32>
    %152 = vector.shape_cast %151 : vector<1xf32> to vector<1x1x1xf32>
    %153 = vector.extract %152[0, 0, 0] : f32 from vector<1x1x1xf32>
    %cst_66 = arith.constant 1.38888892E-4 : f32
    %154 = arith.mulf %153, %cst_66 : f32
    %155 = arith.mulf %148, %148 : f32
    %156 = arith.subf %154, %155 : f32
    %cst_67 = arith.constant 0.000000e+00 : f32
    %157 = arith.maximumf %156, %cst_67 : f32
    %158 = vector.broadcast %148 : f32 to vector<32x384xf32>
    %159 = arith.subf %117, %158 : vector<32x384xf32>
    %cst_68 = arith.constant 9.99999974E-6 : f32
    %160 = arith.addf %157, %cst_68 : f32
    %161 = math.rsqrt %160 : f32
    %162 = vector.broadcast %161 : f32 to vector<32x384xf32>
    %163 = arith.mulf %159, %162 : vector<32x384xf32>
    %c0_69 = arith.constant 0 : index
    %c4_70 = arith.constant 4 : index
    %164 = vector.load %arg4[%c0_69, %c4_70] : memref<32x8xf32, #tpu.memory_space<vmem>>, vector<32x1xf32>
    %165 = vector.broadcast %164 : vector<32x1xf32> to vector<32x384xf32>
    %166 = arith.mulf %163, %165 : vector<32x384xf32>
    %c0_71 = arith.constant 0 : index
    %c5 = arith.constant 5 : index
    %167 = vector.load %arg4[%c0_71, %c5] : memref<32x8xf32, #tpu.memory_space<vmem>>, vector<32x1xf32>
    %168 = vector.broadcast %167 : vector<32x1xf32> to vector<32x384xf32>
    %169 = arith.addf %166, %168 : vector<32x384xf32>
    %cst_72 = arith.constant 0.000000e+00 : f32
    %170 = vector.broadcast %cst_72 : f32 to vector<32x384xf32>
    %171 = arith.maximumf %169, %170 : vector<32x384xf32>
    %c0_73 = arith.constant 0 : index
    %c0_74 = arith.constant 0 : index
    %c0_75 = arith.constant 0 : index
    %172 = vector.load %arg5[%c0_73, %c0_74, %c0_75] : memref<1x32x384xf32, #tpu.memory_space<vmem>>, vector<1x32x384xf32>
    %173 = vector.shape_cast %172 : vector<1x32x384xf32> to vector<32x384xf32>
    %174 = vector.shape_cast %171 : vector<32x384xf32> to vector<1x32x384xf32>
    tpu.vector_store %arg5[%c0_73, %c0_74, %c0_75], %174 {strides = array<i32>} : memref<1x32x384xf32, #tpu.memory_space<vmem>>, vector<1x32x384xf32>,
    return
  }
  func.func @transform_0(%arg0: i32) -> (i32, i32, i32) {
    %c0_i32 = arith.constant 0 : i32
    %c0_i32_0 = arith.constant 0 : i32
    %c0_i32_1 = arith.constant 0 : i32
    return %arg0, %c0_i32, %c0_i32_0 : i32, i32, i32
  }
  func.func @transform_1(%arg0: i32) -> (i32, i32) {
    %c0_i32 = arith.constant 0 : i32
    %c0_i32_0 = arith.constant 0 : i32
    %c0_i32_1 = arith.constant 0 : i32
    return %c0_i32, %c0_i32_0 : i32, i32
  }
  func.func @transform_2(%arg0: i32) -> (i32, i32) {
    %c0_i32 = arith.constant 0 : i32
    %c0_i32_0 = arith.constant 0 : i32
    %c0_i32_1 = arith.constant 0 : i32
    return %c0_i32, %c0_i32_0 : i32, i32
  }
  func.func @transform_3(%arg0: i32) -> (i32, i32) {
    %c0_i32 = arith.constant 0 : i32
    %c0_i32_0 = arith.constant 0 : i32
    %c0_i32_1 = arith.constant 0 : i32
    return %c0_i32, %c0_i32_0 : i32, i32
  }
  func.func @transform_4(%arg0: i32) -> (i32, i32, i32) {
    %c0_i32 = arith.constant 0 : i32
    %c0_i32_0 = arith.constant 0 : i32
    %c0_i32_1 = arith.constant 0 : i32
    return %arg0, %c0_i32, %c0_i32_0 : i32, i32, i32
  }
}

</mosaic_0001>

<bundles_post_ra>
// kernel: upconv_block_forward.1
= control target key start
LH: loop header
LB: loop body
LE: loop exit
PB: predicated region body
PF: predicated region fallthrough
CT: control target
= control target key end

     0   :  { %s1864_s15 = smov 0   ;;  %s2457_s0 = inlined_call_operand.vmem [shape: f32[2,4,450], index: 0, kind: input, shape index: {}]   ;;  %s2458_s1 = inlined_call_operand.vmem [shape: f32[32,36], index: 1, kind: input, shape index: {}]   ;;  %s2459_s2 = inlined_call_operand.vmem [shape: f32[32,128], index: 2, kind: input, shape index: {}]   ;;  %s2460_s3 = inlined_call_operand.vmem [shape: f32[32,8], index: 3, kind: input, shape index: {}]   ;;  %s2461_s4 = inlined_call_operand.vmem [shape: f32[2,32,384], index: 4, kind: output, shape index: {}]  }
   0x1 LB: > { %s1658_s16 = sadd.s32 4294967295, %s1821_s15   ;;  %p1662_p0 = scmp.ge.s32.totalorder %s1821_s15, 1  ;;  %s1821_s15 = sphi %s1864_s15, %s14_s15  }
   0x2   : > { %p162_p1 = scmp.lt.s32.totalorder %s1821_s15, 3 }
   0x4   : > { %p163_p2 = pnand %p1662_p0, %p162_p1 }
   0x5   : > { %p188_p3 = scmp.lt.s32.totalorder (!%p163_p2), %s1658_s16, 1  ;;  %s1823_s21 = smov (!%p163_p2), 90  }
   0x6   : > { %166 = sbr.rel (%p163_p2) target bundleno = 1439 (0x59f), region = 36  ;;  %s1824_s22 = smov (!%p163_p2), 92  }
   0x7   : > { %s1825_s23 = smov (!%p163_p2), 91   ;;  %s1826_s24 = smov (!%p163_p2), 109  }
   0x8   : > { %s1827_s25 = smov (!%p163_p2), 108   ;;  %s1828_s26 = smov (!%p163_p2), 126  }
   0x9   : > { %s1829_s27 = smov (!%p163_p2), 110   ;;  %s1830_s28 = smov (!%p163_p2), 127  }
   0xa   : > { %s1835_s30 = smov (!%p163_p2), 0.0  }
   0xb   : > { %s2463_s16 = smov (!%p188_p3, %s1658_s16), 1  ;;  %vm209_vm0 = vcmask 158720   ;;  %v1831_v6 = vmov 0.0   ;;  %v1900_v7 = vld [vmem:[%s2460_s3] sm:$0xff]  ;;  %v1905_v8 = vld [vmem:[%s2460_s3 + $0x8] sm:$0xff]  ;;  %v1832_v9 = vmov 0  }
   0xc   : > { %s1686_s17 = sshll.u32 %s2463_s16, 4  ;;  %512 = vmatprep.mubr.f32.mxu0 %v1831_v6  ;;  %601 = vmatprep.mubr.f32.mxu1 %v1831_v6  ;;  %v1912_v10 = vld [vmem:[%s2460_s3 + $0x18] sm:$0xff]  ;;  %v1917_v11 = vld [vmem:[%s2460_s3 + $0x10] sm:$0xff]  ;;  %vm322_vm1 = vcmask 752640   ;;  %vm362_vm2 = vcmask 736256   ;;  %vm342_vm3 = vcmask 744448  }
   0xd   : > { %s192_s20 = scalar_lea.vmem %s2457_s0, %s1686_s17  ;;  %1788 = vset.pattern.permute.xlu0 %v1832_v9  ;;  %1789 = vset.pattern.permute.xlu1 %v1832_v9  ;;  %vm435_vm4 = vcmask 1043456   ;;  %vm282_vm5 = vcmask 891904   ;;  %vm302_vm6 = vcmask 883712   ;;  %vm242_vm7 = vcmask 1031168   ;;  %s1745_s9 = smul.u32 96, %s2463_s16 }
   0xe   : > { %v199_v0 = vld [vmem:[%s192_s20 + $0x8] sm:$0xff]  ;;  %v198_v1 = vld [vmem:[%s192_s20] sm:$0xff]  ;;  %vm262_vm8 = vcmask 900096   ;;  %vm232_vm9 = vcmask 162820   ;;  %vm221_vm10 = vcmask 1039360   ;;  %vm422_vm11 = vcmask 293888  }
   0xf   : > { %358 = vrot.lane.b32.xlu0 %v199_v0, %s1823_s21  ;;  %208 = vst [vmem:[#allocation2 + $0x10] sm:$0xf] %v199_v0  ;;  %354 = vrot.lane.b32.xlu1 %v198_v1, %s1823_s21  ;;  %206 = vst [vmem:[#allocation2] sm:$0xf] %v198_v1  ;;  %v202_v2 = vcombine.high %v198_v1, %v198_v1  ;;  %v203_v3 = vcombine.high %v199_v0, %v199_v0  ;;  %s2437_s10 = scalar_lea.vmem %s2461_s4, %s1745_s9 }
  0x10   : > { %v212_v4 = vcombine.low %v199_v0, %v199_v0  ;;  %v211_v5 = vcombine.low %v198_v1, %v198_v1 }
  0x11   : > { %207 = vst [vmem:[#allocation2 + $0x8] sm:$0xf] %v202_v2  ;;  %210 = vst.msk [vmem:[#allocation2 + $0x18] sm:$0xf] %vm209_vm0, %v203_v3 }
  0x13   : > { %318 = vrot.lane.b32.xlu0 %v199_v0, %s1824_s22  ;;  %336 = vrot.lane.b32.xlu1 %v198_v1, %s1825_s23 }
  0x17   : > { %316 = vrot.lane.b32.xlu1 %v202_v2, %s1824_s22  ;;  %356 = vrot.lane.b32.xlu0 %v202_v2, %s1823_s21 }
  0x1b   : > { %314 = vrot.lane.b32.xlu1 %v198_v1, %s1824_s22  ;;  %338 = vrot.lane.b32.xlu0 %v212_v4, %s1825_s23 }
  0x1f   : > { %276 = vrot.lane.b32.xlu1 %v202_v2, %s1826_s24  ;;  %334 = vrot.lane.b32.xlu0 %v211_v5, %s1825_s23 }
  0x23   : > { %296 = vrot.lane.b32.xlu1 %v198_v1, %s1827_s25  ;;  %278 = vrot.lane.b32.xlu0 %v199_v0, %s1826_s24 }
  0x27   : > { %360 = vrot.lane.b32.xlu1 %v203_v3, %s1823_s21  ;;  %298 = vrot.lane.b32.xlu0 %v212_v4, %s1827_s25 }
  0x2b   : > { %294 = vrot.lane.b32.xlu1 %v211_v5, %s1827_s25  ;;  %274 = vrot.lane.b32.xlu0 %v198_v1, %s1826_s24 }
  0x2f   : > { %238 = vrot.lane.b32.xlu1 %v199_v0, %s1828_s26  ;;  %236 = vrot.lane.b32.xlu0 %v202_v2, %s1828_s26 }
  0x33   : > { %258 = vrot.lane.b32.xlu1 %v212_v4, %s1829_s27  ;;  %256 = vrot.lane.b32.xlu0 %v198_v1, %s1829_s27 }
  0x37   : > { %340 = vrot.lane.b32.xlu1 %v199_v0, %s1825_s23  ;;  %320 = vrot.lane.b32.xlu0 %v203_v3, %s1824_s22 }
  0x3b   : > { %254 = vrot.lane.b32.xlu1 %v211_v5, %s1829_s27  ;;  %234 = vrot.lane.b32.xlu0 %v198_v1, %s1828_s26 }
  0x3f   : > { %217 = vrot.lane.b32.xlu1 %v212_v4, %s1830_s28  ;;  %215 = vrot.lane.b32.xlu0 %v198_v1, %s1830_s28 }
  0x43   : > { %300 = vrot.lane.b32.xlu1 %v199_v0, %s1827_s25  ;;  %280 = vrot.lane.b32.xlu0 %v203_v3, %s1826_s24 }
  0x47   : > { %240 = vrot.lane.b32.xlu1 %v203_v3, %s1828_s26  ;;  %213 = vrot.lane.b32.xlu0 %v211_v5, %s1830_s28 }
  0x4b   : > { %219 = vrot.lane.b32.xlu1 %v199_v0, %s1830_s28  ;;  %260 = vrot.lane.b32.xlu0 %v199_v0, %s1829_s27 }
  0x4f   : > { %404 = vperm.xlu0 %1788, %v1900_v7   ;;  %409 = vperm.xlu1 %1789, %v1905_v8  }
  0x53   : > { %419 = vperm.xlu0 %1788, %v1912_v10   ;;  %414 = vperm.xlu1 %1789, %v1917_v11  }
  0x81   : > { %v359_v12 = vpop.permute.xlu0 %358  ;;  %v355_v13 = vpop.permute.xlu1 %354 }
  0x85   : > { %v1921_v14 = vpop.permute.xlu0 %318  ;;  %v337_v15 = vpop.permute.xlu1 %336 }
  0x89   : > { %v317_v16 = vpop.permute.xlu1 %316  ;;  %v357_v17 = vpop.permute.xlu0 %356 }
  0x8a   : > { %v324_v18 = vsel %vm322_vm1, %v317_v16, %v1921_v14  ;;  %v363_v19 = vsel %vm362_vm2, %v355_v13, %v357_v17  ;;  %v364_v20 = vsel %vm362_vm2, %v357_v17, %v359_v12 }
  0x8b   : > { %331 = vst [vmem:[#allocation2 + $0x68] sm:$0xf] %v324_v18  ;;  %370 = vst [vmem:[#allocation2 + $0x80] sm:$0xf] %v363_v19 }
  0x8c   : > { %371 = vst [vmem:[#allocation2 + $0x88] sm:$0xf] %v364_v20 }
  0x8d   : > { %v315_v21 = vpop.permute.xlu1 %314  ;;  %v339_v22 = vpop.permute.xlu0 %338 }
  0x8e   : > { %v323_v23 = vsel %vm322_vm1, %v315_v21, %v317_v16  ;;  %v344_v24 = vsel %vm342_vm3, %v337_v15, %v339_v22 }
  0x8f   : > { %330 = vst [vmem:[#allocation2 + $0x60] sm:$0xf] %v323_v23  ;;  %351 = vst [vmem:[#allocation2 + $0x68] sm:$0xf0] %v344_v24  ;;  %v374_v24 = vld [vmem:[%s2458_s1] sm:$0xff] }
  0x91   : > { %v277_v25 = vpop.permute.xlu1 %276  ;;  %v335_v26 = vpop.permute.xlu0 %334 }
  0x92   : > { %v343_v27 = vsel %vm342_vm3, %v335_v26, %v337_v15  ;;  %v394_v29 = vld [vmem:[#allocation2 + $0x80] sm:$0xf] }
  0x93   : > { %v395_v28 = vld [vmem:[#allocation2 + $0x88] sm:$0xf]  ;;  %350 = vst [vmem:[#allocation2 + $0x60] sm:$0xf0] %v343_v27 }
  0x94   : > { %1666 = vmatprep.subr.msk.mxu0 %vm435_vm4, %v395_v28  ;;  %v375_v27 = vld [vmem:[%s2458_s1 + $0x8] sm:$0xff] }
  0x95   : > { %1667 = vmatpush1.msk.msra.mxu0 %vm435_vm4, %v394_v29  ;;  %v297_v30 = vpop.permute.xlu1 %296  ;;  %v1932_v31 = vpop.permute.xlu0 %278 }
  0x96   : > { %v284_v32 = vsel %vm282_vm5, %v277_v25, %v1932_v31  ;;  %v391_v33 = vld [vmem:[#allocation2 + $0x68] sm:$0xff] }
  0x97   : > { %291 = vst [vmem:[#allocation2 + $0x48] sm:$0xf] %v284_v32  ;;  %472 = vmatprep.subr.mxu0 %v391_v33  ;;  %v377_v32 = vld [vmem:[%s2458_s1 + $0x18] sm:$0xff]  ;;  %v1833_v33 = vmov 2  }
  0x98   : > { %1791 = vset.pattern.permute.xlu1 %v1833_v33 }
  0x99   : > { %v361_v34 = vpop.permute.xlu1 %360  ;;  %v299_v35 = vpop.permute.xlu0 %298 }
  0x9a   : > { %v365_v36 = vsel %vm362_vm2, %v359_v12, %v361_v34  ;;  %373 = vst.msk [vmem:[#allocation2 + $0x98] sm:$0xf] %vm209_vm0, %v361_v34  ;;  %v304_v37 = vsel %vm302_vm6, %v297_v30, %v299_v35  ;;  %v390_v38 = vld [vmem:[#allocation2 + $0x60] sm:$0xff]  ;;  %v1834_v34 = vmov 1  }
  0x9b   : > { %372 = vst [vmem:[#allocation2 + $0x90] sm:$0xf] %v365_v36  ;;  %311 = vst [vmem:[#allocation2 + $0x48] sm:$0xf0] %v304_v37  ;;  %473 = vmatpush1.msra.mxu0 %v390_v38  ;;  %1790 = vset.pattern.permute.xlu0 %v1834_v34 }
  0x9d   : > { %v295_v39 = vpop.permute.xlu1 %294  ;;  %v275_v40 = vpop.permute.xlu0 %274 }
  0x9e   : > { %v303_v41 = vsel %vm302_vm6, %v295_v39, %v297_v30  ;;  %v283_v42 = vsel %vm282_vm5, %v275_v40, %v277_v25 }
  0x9f   : > { %310 = vst [vmem:[#allocation2 + $0x40] sm:$0xf0] %v303_v41  ;;  %290 = vst [vmem:[#allocation2 + $0x40] sm:$0xf] %v283_v42 }
  0xa1   : > { %v239_v43 = vpop.permute.xlu1 %238  ;;  %v237_v44 = vpop.permute.xlu0 %236  ;;  %v397_v45 = vld [vmem:[#allocation2 + $0x98] sm:$0xf] }
  0xa2   : > { %v244_v46 = vsel %vm242_vm7, %v237_v44, %v239_v43  ;;  %1672 = vmatprep.subr.msk.mxu1 %vm435_vm4, %v397_v45  ;;  %v387_v47 = vld [vmem:[#allocation2 + $0x48] sm:$0xff]  ;;  %v396_v48 = vld [vmem:[#allocation2 + $0x90] sm:$0xf] }
  0xa3   : > { %251 = vst [vmem:[#allocation2 + $0x28] sm:$0xf] %v244_v46  ;;  %474 = vmatprep.subr.mxu0 %v387_v47  ;;  %1673 = vmatpush1.msk.msra.mxu1 %vm435_vm4, %v396_v48 }
  0xa5   : > { %v259_v49 = vpop.permute.xlu1 %258  ;;  %v257_v50 = vpop.permute.xlu0 %256 }
  0xa6   : > { %v264_v51 = vsel %vm262_vm8, %v257_v50, %v259_v49  ;;  %v386_v52 = vld [vmem:[#allocation2 + $0x40] sm:$0xff] }
  0xa7   : > { %271 = vst [vmem:[#allocation2 + $0x28] sm:$0xf0] %v264_v51  ;;  %475 = vmatpush1.msra.mxu0 %v386_v52 }
  0xa9   : > { %v341_v53 = vpop.permute.xlu1 %340  ;;  %v321_v54 = vpop.permute.xlu0 %320 }
  0xaa   : > { %v345_v55 = vsel %vm342_vm3, %v339_v22, %v341_v53  ;;  %353 = vst.msk [vmem:[#allocation2 + $0x78] sm:$0xf0] %vm232_vm9, %v341_v53  ;;  %v325_v56 = vsel %vm322_vm1, %v1921_v14, %v321_v54 }
  0xab   : > { %333 = vst.msk [vmem:[#allocation2 + $0x78] sm:$0xf] %vm209_vm0, %v321_v54  ;;  %352 = vst [vmem:[#allocation2 + $0x70] sm:$0xf0] %v345_v55 }
  0xac   : > { %332 = vst [vmem:[#allocation2 + $0x70] sm:$0xf] %v325_v56 }
  0xad   : > { %v255_v57 = vpop.permute.xlu1 %254  ;;  %v235_v58 = vpop.permute.xlu0 %234 }
  0xae   : > { %v263_v59 = vsel %vm262_vm8, %v255_v57, %v257_v50  ;;  %v243_v60 = vsel %vm242_vm7, %v235_v58, %v237_v44  ;;  %v383_v61 = vld [vmem:[#allocation2 + $0x28] sm:$0xff] }
  0xaf   : > { %270 = vst [vmem:[#allocation2 + $0x20] sm:$0xf0] %v263_v59  ;;  %250 = vst [vmem:[#allocation2 + $0x20] sm:$0xf] %v243_v60  ;;  %476 = vmatprep.subr.mxu0 %v383_v61 }
  0xb1   : > { %v218_v62 = vpop.permute.xlu1 %217  ;;  %v216_v63 = vpop.permute.xlu0 %215 }
  0xb2   : > { %v393_v0 = vld [vmem:[#allocation2 + $0x78] sm:$0xff]  ;;  %v223_v1 = vsel %vm221_vm10, %v216_v63, %v218_v62 }
  0xb3   : > { %561 = vmatprep.subr.mxu1 %v393_v0  ;;  %v392_v2 = vld [vmem:[#allocation2 + $0x70] sm:$0xff]  ;;  %230 = vst [vmem:[#allocation2 + $0x8] sm:$0xf0] %v223_v1 }
  0xb4   : > { %562 = vmatpush1.msra.mxu1 %v392_v2 }
  0xb5   : > { %v301_v3 = vpop.permute.xlu1 %300  ;;  %v281_v4 = vpop.permute.xlu0 %280 }
  0xb6   : > { %v305_v5 = vsel %vm302_vm6, %v299_v35, %v301_v3  ;;  %313 = vst.msk [vmem:[#allocation2 + $0x58] sm:$0xf0] %vm232_vm9, %v301_v3  ;;  %v285_v9 = vsel %vm282_vm5, %v1932_v31, %v281_v4  ;;  %v382_v12 = vld [vmem:[#allocation2 + $0x20] sm:$0xff]  ;;  %v376_v31 = vld [vmem:[%s2458_s1 + $0x10] sm:$0xff]  ;;  %v626_v35 = vlaneseq }
  0xb7   : > { %293 = vst.msk [vmem:[#allocation2 + $0x58] sm:$0xf] %vm209_vm0, %v281_v4  ;;  %312 = vst [vmem:[#allocation2 + $0x50] sm:$0xf0] %v305_v5  ;;  %477 = vmatpush1.msra.mxu0 %v382_v12 }
  0xb8   : > { %292 = vst [vmem:[#allocation2 + $0x50] sm:$0xf] %v285_v9  ;;  %v627_v36 = vand.u32 127, %v626_v35 }
  0xb9   : > { %v241_v13 = vpop.permute.xlu1 %240  ;;  %v214_v14 = vpop.permute.xlu0 %213 }
  0xba   : > { %v245_v15 = vsel %vm242_vm7, %v239_v43, %v241_v13  ;;  %253 = vst.msk [vmem:[#allocation2 + $0x38] sm:$0xf] %vm209_vm0, %v241_v13  ;;  %v222_v16 = vsel %vm221_vm10, %v214_v14, %v216_v63  ;;  %v379_v17 = vld [vmem:[#allocation2 + $0x8] sm:$0xff]  ;;  %v628_v37 = vadd.s32 128, %v627_v36  ;;  %v1994_v38 = vadd.s32 256, %v627_v36 }
  0xbb   : > { %252 = vst [vmem:[#allocation2 + $0x30] sm:$0xf] %v245_v15  ;;  %229 = vst [vmem:[#allocation2] sm:$0xf0] %v222_v16  ;;  %478 = vmatprep.subr.mxu0 %v379_v17  ;;  %v1996_v39 = vmul.u32.u64.low 3817748708, %v627_v36  ;;  %v1997_v40 = vmul.u32.u64.high 3817748708, %v627_v36, %v1996_v39 }
  0xbc   : > { %v1999_v41 = vmul.u32.u64.low 3817748708, %v628_v37  ;;  %v2000_v42 = vmul.u32.u64.high 3817748708, %v628_v37, %v1999_v41  ;;  %v2003_v43 = vmul.u32.u64.low 3817748708, %v1994_v38  ;;  %v2004_v44 = vmul.u32.u64.high 3817748708, %v1994_v38, %v2003_v43 }
  0xbd   : > { %v220_v18 = vpop.permute.xlu1 %219  ;;  %v261_v19 = vpop.permute.xlu0 %260  ;;  %v637_v45 = vshrl.u32 %v1997_v40, 4 }
  0xbe   : > { %v389_v20 = vld [vmem:[#allocation2 + $0x58] sm:$0xff]  ;;  %v224_v21 = vsel %vm221_vm10, %v218_v62, %v220_v18  ;;  %233 = vst.msk [vmem:[#allocation2 + $0x18] sm:$0xf0] %vm232_vm9, %v220_v18  ;;  %v265_v22 = vsel %vm262_vm8, %v259_v49, %v261_v19  ;;  %273 = vst.msk [vmem:[#allocation2 + $0x38] sm:$0xf0] %vm232_vm9, %v261_v19  ;;  %v648_v46 = vshrl.u32 %v2000_v42, 4 }
  0xbf   : > { %563 = vmatprep.subr.mxu1 %v389_v20  ;;  %v388_v23 = vld [vmem:[#allocation2 + $0x50] sm:$0xff]  ;;  %231 = vst [vmem:[#allocation2 + $0x10] sm:$0xf0] %v224_v21  ;;  %272 = vst [vmem:[#allocation2 + $0x30] sm:$0xf0] %v265_v22  ;;  %v659_v47 = vshrl.u32 %v2004_v44, 4 }
  0xc0   : > { %564 = vmatpush1.msra.mxu1 %v388_v23  ;;  %v638_v48 = vmul.u32 18, %v637_v45  ;;  %v649_v49 = vmul.u32 18, %v648_v46 }
  0xc1   : > { %v660_v50 = vmul.u32 18, %v659_v47 }
  0xc2   : > { %v378_v25 = vld [vmem:[#allocation2] sm:$0xff]  ;;  %v639_v51 = vsub.s32 %v627_v36, %v638_v48  ;;  %v650_v52 = vsub.s32 %v628_v37, %v649_v49 }
  0xc3   : > { %479 = vmatpush1.msra.mxu0 %v378_v25  ;;  %v661_v53 = vsub.s32 %v1994_v38, %v660_v50 }
  0xc4   : > { %1668 = vmatmul.mubr.msk.f32.vlgmr.msra.gmra.mxu0 %vm422_vm11, %v374_v24  ;;  %vm675_vm12 = vcmp.ne.s32.totalorder %v639_v51, 0  ;;  %vm679_vm13 = vcmp.lt.s32.totalorder %v639_v51, 0  ;;  %vm676_vm14 = vcmp.ne.s32.totalorder %v650_v52, 0  ;;  %vm680_vm15 = vcmp.lt.s32.totalorder %v650_v52, 0 }
  0xc5   : > { %v385_v26 = vld [vmem:[#allocation2 + $0x38] sm:$0xff]  ;;  %518 = vmatprep.mubr.f32.mxu0 %v1831_v6  ;;  %v687_v54 = vadd.s32 18, %v639_v51  ;;  %vm683_vm0 = vmand %vm679_vm13, %vm675_vm12  ;;  %vm677_vm1 = vcmp.ne.s32.totalorder %v661_v53, 0  ;;  %vm681_vm2 = vcmp.lt.s32.totalorder %v661_v53, 0  ;;  %v688_v55 = vadd.s32 18, %v650_v52 }
  0xc6   : > { %v381_v28 = vld [vmem:[#allocation2 + $0x18] sm:$0xff]  ;;  %565 = vmatprep.subr.mxu1 %v385_v26  ;;  %v384_v29 = vld [vmem:[#allocation2 + $0x30] sm:$0xff]  ;;  %vm684_vm3 = vmand %vm680_vm15, %vm676_vm14  ;;  %v689_v56 = vadd.s32 18, %v661_v53  ;;  %vm733_vm13 = vcmask 162816  }
  0xc7   : > { %566 = vmatpush1.msra.mxu1 %v384_v29  ;;  %v380_v30 = vld [vmem:[#allocation2 + $0x10] sm:$0xff]  ;;  %v2010_v57 = vsel %vm683_vm0, %v687_v54, %v639_v51  ;;  %vm685_vm4 = vmand %vm681_vm2, %vm677_vm1  ;;  %v2012_v58 = vsel %vm684_vm3, %v688_v55, %v650_v52 }
  0xc8   : > { %1669 = vmatmul.mubr.msk.f32.gmra.mxu0 %vm422_vm11, %v375_v27  ;;  %567 = vmatprep.subr.mxu1 %v381_v28  ;;  %vm695_vm6 = vcmp.lt.s32.totalorder %v2010_v57, 16  ;;  %v2015_v59 = vsel %vm685_vm4, %v689_v56, %v661_v53  ;;  %vm696_vm7 = vcmp.lt.s32.totalorder %v2012_v58, 16  ;;  %vm1410_vm14 = vcmp.lt.s32.totalorder %v2012_v58, 15 }
  0xc9   : > { %568 = vmatpush1.msra.mxu1 %v380_v30  ;;  %524 = vmatprep.mubr.f32.mxu0 %v1831_v6  ;;  %v2019_v62 = vsel %vm695_vm6, 1.0, %v1831_v6  ;;  %vm697_vm9 = vcmp.lt.s32.totalorder %v2015_v59, 16  ;;  %v2026_v1 = vsel %vm696_vm7, 1.0, %v1831_v6 }
  0xca   : > { %1674 = vmatmul.mubr.msk.f32.vlgmr.msra.gmra.mxu1 %vm422_vm11, %v374_v24  ;;  %v405_v61 = vpop.permute.xlu0 %404  ;;  %v410_v12 = vpop.permute.xlu1 %409 }
  0xcb   : > { %607 = vmatprep.mubr.f32.mxu1 %v1831_v6 }
  0xcc   : > { %1670 = vmatmul.mubr.msk.f32.gmra.mxu0 %vm422_vm11, %v376_v31 }
  0xcd   : > { %530 = vmatprep.mubr.f32.mxu0 %v1831_v6 }
  0xce   : > { %1675 = vmatmul.mubr.msk.f32.gmra.mxu1 %vm422_vm11, %v375_v27 }
  0xcf   : > { %613 = vmatprep.mubr.f32.mxu1 %v1831_v6 }
  0xd0   : > { %1671 = vmatmul.mubr.msk.f32.gmra.mxu0 %vm422_vm11, %v377_v32 }
  0xd1   : > { %1299 = vmatprep.mubr.f32.mxu0 %v1831_v6 }
  0xd2   : > { %1676 = vmatmul.mubr.msk.f32.gmra.mxu1 %vm422_vm11, %v376_v31 }
  0xd3   : > { %619 = vmatprep.mubr.f32.mxu1 %v1831_v6 }
  0xd6   : > { %1677 = vmatmul.mubr.msk.f32.gmra.mxu1 %vm422_vm11, %v377_v32  ;;  %vm701_vm11 = vcmp.lt.s32.totalorder %v1994_v38, 288  ;;  %v415_v32 = vpop.permute.xlu1 %414 }
  0xd7   : > { %vm705_vm12 = vmand %vm697_vm9, %vm701_vm11 }
  0xd8   : > { %v2035_v14 = vsel %vm705_vm12, 1.0, %v1831_v6 }
 0x184   : > { %v514_v60 = vpop.f32.mrf.mxu0 }
 0x185   : > { %v2023_v63 = vadd.f32 %v514_v60, %v405_v61 }
 0x186   : > { %v516_v0 = vpop.f32.mrf.mxu0 }
 0x187   : > { %v2028_v2 = vadd.f32 %v516_v0, %v405_v61  ;;  %v715_v3 = vmul.f32 %v2019_v62, %v2023_v63 }
 0x188   : > { %v520_v4 = vpop.f32.mrf.mxu0 }
 0x189   : > { %v716_v5 = vmul.f32 %v2026_v1, %v2028_v2  ;;  %v761_v9 = vmul.f32 %v715_v3, %v715_v3  ;;  %v2037_v15 = vadd.f32 %v520_v4, %v410_v12 }
 0x18a   : > { %v603_v13 = vpop.f32.mrf.mxu1  ;;  %v522_v18 = vpop.f32.mrf.mxu0 }
 0x18b   : > { %v731_v16 = vadd.f32 %v716_v5, %v715_v3  ;;  %v762_v17 = vmul.f32 %v716_v5, %v716_v5  ;;  %v2039_v19 = vadd.f32 %v603_v13, %v405_v61  ;;  %v2045_v24 = vadd.f32 %v522_v18, %v410_v12 }
 0x18c   : > { %v605_v20 = vpop.f32.mrf.mxu1  ;;  %v719_v25 = vmul.f32 %v2019_v62, %v2037_v15  ;;  %v526_v29 = vpop.f32.mrf.mxu0 }
 0x18d   : > { %v777_v21 = vadd.f32 %v762_v17, %v761_v9  ;;  %v717_v22 = vmul.f32 %v2035_v14, %v2039_v19  ;;  %v2043_v23 = vadd.f32 %v605_v20, %v405_v61  ;;  %v720_v40 = vmul.f32 %v2026_v1, %v2045_v24  ;;  %v420_v17 = vpop.permute.xlu0 %419 }
 0x18e   : > { %v609_v26 = vpop.f32.mrf.mxu1  ;;  %v765_v41 = vmul.f32 %v719_v25, %v719_v25  ;;  %v528_v45 = vpop.f32.mrf.mxu0  ;;  %v2056_v46 = vadd.f32 %v526_v29, %v415_v32 }
 0x18f   : > { %v732_v27 = vadd.f32 %v731_v16, %v717_v22  ;;  %v763_v28 = vmul.f32 %v717_v22, %v717_v22  ;;  %v718_v30 = vmul.f32 0.0, %v2043_v23  ;;  %v2050_v31 = vadd.f32 %v609_v26, %v410_v12 }
 0x190   : > { %v611_v35 = vpop.f32.mrf.mxu1  ;;  %v766_v53 = vmul.f32 %v720_v40, %v720_v40  ;;  %v2063_v56 = vadd.f32 %v528_v45, %v415_v32  ;;  %v723_v60 = vmul.f32 %v2019_v62, %v2056_v46  ;;  %v532_v61 = vpop.f32.mrf.mxu0 }
 0x191   : > { %v778_v36 = vadd.f32 %v777_v21, %v763_v28  ;;  %v734_v37 = vsel %vm733_vm13, %v718_v30, 0.0  ;;  %v764_v39 = vmul.f32 %v718_v30, %v718_v30  ;;  %v2058_v47 = vadd.f32 %v611_v35, %v410_v12 }
 0x192   : > { %v735_v42 = vadd.f32 %v734_v37, %v732_v27  ;;  %v615_v43 = vpop.f32.mrf.mxu1  ;;  %v721_v50 = vmul.f32 %v2035_v14, %v2050_v31  ;;  %v724_v20 = vmul.f32 %v2026_v1, %v2063_v56  ;;  %v2074_v22 = vadd.f32 %v532_v61, %v420_v17  ;;  %v534_v26 = vpop.f32.mrf.mxu0 }
 0x193   : > { %v779_v44 = vsel %vm733_vm13, %v764_v39, 0.0  ;;  %v722_v52 = vmul.f32 0.0, %v2058_v47  ;;  %v2069_v12 = vadd.f32 %v615_v43, %v415_v32  ;;  %v769_v28 = vmul.f32 %v723_v60, %v723_v60 }
 0x194   : > { %v736_v48 = vadd.f32 %v735_v42, %v719_v25  ;;  %v780_v49 = vadd.f32 %v779_v44, %v778_v36  ;;  %v617_v51 = vpop.f32.mrf.mxu1  ;;  %v767_v5 = vmul.f32 %v721_v50, %v721_v50  ;;  %v770_v36 = vmul.f32 %v724_v20, %v724_v20 }
 0x195   : > { %v768_v0 = vmul.f32 %v722_v52, %v722_v52  ;;  %v2067_v3 = vadd.f32 %v617_v51, %v415_v32  ;;  %v739_v16 = vsel %vm733_vm13, %v722_v52, 0.0  ;;  %v725_v32 = vmul.f32 %v2035_v14, %v2069_v12 }
 0x196   : > { %v781_v54 = vadd.f32 %v780_v49, %v765_v41  ;;  %v737_v55 = vadd.f32 %v736_v48, %v720_v40  ;;  %v621_v13 = vpop.f32.mrf.mxu1  ;;  %v2080_v39 = vadd.f32 %v534_v26, %v420_v17  ;;  %v727_v41 = vmul.f32 %v2019_v62, %v2074_v22 }
 0x197   : > { %v784_v25 = vsel %vm733_vm13, %v768_v0, 0.0  ;;  %v726_v27 = vmul.f32 0.0, %v2067_v3  ;;  %v771_v45 = vmul.f32 %v725_v32, %v725_v32  ;;  %v2086_v49 = vadd.f32 %v621_v13, %v420_v17 }
 0x198   : > { %v738_v4 = vadd.f32 %v737_v55, %v721_v50  ;;  %v782_v9 = vadd.f32 %v781_v54, %v766_v53  ;;  %v623_v35 = vpop.f32.mrf.mxu1  ;;  %v728_v51 = vmul.f32 %v2026_v1, %v2080_v39  ;;  %v773_v62 = vmul.f32 %v727_v41, %v727_v41 }
 0x199   : > { %v772_v42 = vmul.f32 %v726_v27, %v726_v27  ;;  %v2084_v43 = vadd.f32 %v623_v35, %v420_v17  ;;  %v744_v50 = vsel %vm733_vm13, %v726_v27, 0.0  ;;  %v729_v61 = vmul.f32 %v2035_v14, %v2086_v49 }
 0x19a   : > { %v783_v18 = vadd.f32 %v782_v9, %v767_v5  ;;  %v740_v21 = vadd.f32 %v739_v16, %v738_v4  ;;  %v774_v4 = vmul.f32 %v728_v51, %v728_v51 }
 0x19b   : > { %v789_v54 = vsel %vm733_vm13, %v772_v42, 0.0  ;;  %v730_v55 = vmul.f32 0.0, %v2084_v43  ;;  %v775_v16 = vmul.f32 %v729_v61, %v729_v61 }
 0x19c   : > { %v741_v29 = vadd.f32 %v740_v21, %v723_v60  ;;  %v785_v30 = vadd.f32 %v784_v25, %v783_v18 }
 0x19d   : > { %v776_v13 = vmul.f32 %v730_v55, %v730_v55  ;;  %v749_v1 = vsel %vm733_vm13, %v730_v55, 0.0 }
 0x19e   : > { %v786_v37 = vadd.f32 %v785_v30, %v769_v28  ;;  %v742_v40 = vadd.f32 %v741_v29, %v724_v20 }
 0x19f   : > { %v794_v25 = vsel %vm733_vm13, %v776_v13, 0.0 }
 0x1a0   : > { %v743_v44 = vadd.f32 %v742_v40, %v725_v32  ;;  %v787_v48 = vadd.f32 %v786_v37, %v770_v36 }
 0x1a2   : > { %v788_v52 = vadd.f32 %v787_v48, %v771_v45  ;;  %v745_v53 = vadd.f32 %v744_v50, %v743_v44 }
 0x1a4   : > { %v790_v60 = vadd.f32 %v789_v54, %v788_v52  ;;  %v746_v0 = vadd.f32 %v745_v53, %v727_v41 }
 0x1a6   : > { %v747_v5 = vadd.f32 %v746_v0, %v728_v51  ;;  %v791_v9 = vadd.f32 %v790_v60, %v773_v62 }
 0x1a8   : > { %v748_v17 = vadd.f32 %v747_v5, %v729_v61  ;;  %v792_v18 = vadd.f32 %v791_v9, %v774_v4 }
 0x1aa   : > { %v750_v20 = vadd.f32 %v749_v1, %v748_v17  ;;  %v793_v21 = vadd.f32 %v792_v18, %v775_v16 }
 0x1ac   : > { %751 = vadd.xlane.f32.xlu1 %v750_v20  ;;  %v795_v26 = vadd.f32 %v794_v25, %v793_v21 }
 0x1ae   : > { %796 = vadd.xlane.f32.xlu0 %v795_v26 }
 0x1bd   : > { %892 = vperm.xlu1 %1791, %v1912_v10  }
 0x1c1   : > { %1792 = vset.pattern.permute.xlu1 %v1834_v34 }
 0x1c2   : > { %856 = vperm.xlu1 %1792, %v1917_v11  }
 0x1c4   : > { %860 = vperm.xlu0 %1790, %v1912_v10  }
 0x1c6   : > { %1793 = vset.pattern.permute.xlu1 %v1833_v33 }
 0x1c7   : > { %888 = vperm.xlu1 %1793, %v1917_v11  }
 0x1cb   : > { %1794 = vset.pattern.permute.xlu1 %v1834_v34 }
 0x1cc   : > { %852 = vperm.xlu1 %1794, %v1905_v8  }
 0x1d0   : > { %1795 = vset.pattern.permute.xlu1 %v1833_v33 }
 0x1d1   : > { %884 = vperm.xlu1 %1795, %v1905_v8  }
 0x1d5   : > { %1796 = vset.pattern.permute.xlu1 %v1834_v34 }
 0x1d6   : > { %848 = vperm.xlu1 %1796, %v1900_v7  }
 0x1da   : > { %1797 = vset.pattern.permute.xlu1 %v1833_v33 }
 0x1db   : > { %880 = vperm.xlu1 %1797, %v1900_v7  }
 0x235   : > { %v752_v10 = vpop.xlane.xlu1 %751 }
 0x236   : > { %v753_v14 = vrot.slane %v752_v10, 4 }
 0x237   : > { %v797_v27 = vpop.xlane.xlu0 %796 }
 0x238   : > { %v754_v28 = vadd.f32 %v753_v14, %v752_v10  ;;  %v798_v29 = vrot.slane %v797_v27, 4 }
 0x239   : > { %v893_v13 = vpop.permute.xlu1 %892 }
 0x23a   : > { %v755_v30 = vrot.slane %v754_v28, 2  ;;  %v799_v32 = vadd.f32 %v798_v29, %v797_v27 }
 0x23c   : > { %v800_v35 = vrot.slane %v799_v32, 2  ;;  %v756_v36 = vadd.f32 %v755_v30, %v754_v28 }
 0x23d   : > { %v857_v29 = vpop.permute.xlu1 %856 }
 0x23e   : > { %v757_v37 = vrot.slane %v756_v36, 1  ;;  %v801_v40 = vadd.f32 %v800_v35, %v799_v32 }
 0x23f   : > { %v861_v60 = vpop.permute.xlu0 %860 }
 0x240   : > { %v758_v41 = vadd.f32 %v757_v37, %v756_v36  ;;  %v802_v42 = vrot.slane %v801_v40, 1 }
 0x242   : > { %1752 = vpush %v758_v41  ;;  %v803_v34 = vadd.f32 %v802_v42, %v801_v40  ;;  %v889_v36 = vpop.permute.xlu1 %888 }
 0x244   : > { %1754 = vpush %v803_v34 }
 0x273   : > { %s1753_s21 = spop %1752 }
 0x274   : > { %s760_s22 = smul.f32 0.00012207031, %s1753_s21 }
 0x275   : > { %s1755_s23 = spop %1754 }
 0x276   : > { %s806_s25 = smul.f32 %s760_s22, %s760_s22  ;;  %v2112_v45 = vstv %s760_s22 }
 0x277   : > { %s805_s26 = smul.f32 0.00012207031, %s1755_s23  ;;  %v810_v48 = vsub.f32 %v2023_v63, %v2112_v45  ;;  %v811_v50 = vsub.f32 %v2028_v2, %v2112_v45  ;;  %v812_v51 = vsub.f32 %v2039_v19, %v2112_v45  ;;  %v813_v52 = vsub.f32 %v2043_v23, %v2112_v45 }
 0x278   : > { %v822_v54 = vsub.f32 %v2074_v22, %v2112_v45  ;;  %v823_v55 = vsub.f32 %v2080_v39, %v2112_v45  ;;  %v824_v63 = vsub.f32 %v2086_v49, %v2112_v45  ;;  %v825_v22 = vsub.f32 %v2084_v43, %v2112_v45 }
 0x279   : > { %s807_s29 = ssub.f32 %s805_s26, %s806_s25  ;;  %v820_v10 = vsub.f32 %v2069_v12, %v2112_v45  ;;  %v819_v14 = vsub.f32 %v2063_v56, %v2112_v45  ;;  %v818_v30 = vsub.f32 %v2056_v46, %v2112_v45  ;;  %v821_v56 = vsub.f32 %v2067_v3, %v2112_v45 }
 0x27b   : > { %s808_s5 = smax.f32 %s1835_s30, %s807_s29 }
 0x27c   : > { %s826_s6 = sadd.f32 1e-05, %s808_s5 }
 0x27e   : > { %v827_v33 = vstv %s826_s6 }
 0x27f   : > { %1808 = vrsqrt.f32 %v827_v33 }
 0x28c   : > { %v1809_v44 = vpop.eup %1808 }
 0x28d   : > { %1756 = vpush %v1809_v44 }
 0x2be   : > { %s1757_s7 = spop %1756 }
 0x2bf   : > { %v2122_v53 = vstv %s1757_s7 }
 0x2c0   : > { %v2131_v62 = vmul.f32 %v2122_v53, %v810_v48  ;;  %v2134_v2 = vmul.f32 %v2122_v53, %v811_v50  ;;  %v2137_v19 = vmul.f32 %v2122_v53, %v812_v51  ;;  %v2140_v23 = vmul.f32 %v2122_v53, %v813_v52 }
 0x2c1   : > { %v843_v39 = vmul.f32 %v2122_v53, %v822_v54  ;;  %v844_v49 = vmul.f32 %v2122_v53, %v823_v55  ;;  %v845_v61 = vmul.f32 %v2122_v53, %v824_v63  ;;  %v846_v0 = vmul.f32 %v2122_v53, %v825_v22  ;;  %v853_v63 = vpop.permute.xlu1 %852 }
 0x2c2   : > { %v841_v27 = vmul.f32 %v2122_v53, %v820_v10  ;;  %v840_v28 = vmul.f32 %v2122_v53, %v819_v14  ;;  %v839_v12 = vmul.f32 %v2122_v53, %v818_v30  ;;  %v842_v42 = vmul.f32 %v2122_v53, %v821_v56  ;;  %v2277_v30 = vld [vmem:[%s2459_s2] sm:$0xff] }
 0x2c3   : > { %v875_v4 = vmul.f32 %v861_v60, %v843_v39  ;;  %v876_v5 = vmul.f32 %v861_v60, %v844_v49  ;;  %v877_v9 = vmul.f32 %v861_v60, %v845_v61  ;;  %v878_v18 = vmul.f32 %v861_v60, %v846_v0  ;;  %1739 = vmatprep.mubr.f32.mxu1 %v2277_v30 }
 0x2c4   : > { %v873_v32 = vmul.f32 %v857_v29, %v841_v27  ;;  %v872_v35 = vmul.f32 %v857_v29, %v840_v28  ;;  %v871_v41 = vmul.f32 %v857_v29, %v839_v12  ;;  %v874_v44 = vmul.f32 %v857_v29, %v842_v42 }
 0x2c5   : > { %v908_v16 = vadd.f32 %v893_v13, %v876_v5  ;;  %v909_v17 = vadd.f32 %v893_v13, %v877_v9  ;;  %v907_v1 = vadd.f32 %v893_v13, %v875_v4  ;;  %v910_v25 = vadd.f32 %v893_v13, %v878_v18  ;;  %v885_v49 = vpop.permute.xlu1 %884 }
 0x2c6   : > { %v905_v37 = vadd.f32 %v889_v36, %v873_v32  ;;  %v904_v40 = vadd.f32 %v889_v36, %v872_v35  ;;  %v903_v33 = vadd.f32 %v889_v36, %v871_v41  ;;  %v906_v48 = vadd.f32 %v889_v36, %v874_v44  ;;  %v2296_v35 = vld [vmem:[%s2460_s3 + $0x18] sm:$0xff] }
 0x2c7   : > { %v2148_v20 = vmax.f32 %v909_v17, 0.0  ;;  %v2150_v21 = vmax.f32 %v908_v16, 0.0  ;;  %v2156_v43 = vmax.f32 %v907_v1, 0.0  ;;  %v926_v26 = vmax.f32 %v910_v25, 0.0 }
 0x2c8   : > { %v2187_v46 = vmax.f32 %v905_v37, 0.0  ;;  %v2189_v34 = vmax.f32 %v904_v40, 0.0  ;;  %v2195_v3 = vmax.f32 %v903_v33, 0.0  ;;  %v922_v50 = vmax.f32 %v906_v48, 0.0 }
 0x2c9   : > { %1146 = vrot.lane.b32.xlu0 %v2148_v20, %s1826_s24  ;;  %1144 = vrot.lane.b32.xlu1 %v2150_v21, %s1826_s24  ;;  %v816_v51 = vsub.f32 %v2050_v31, %v2112_v45  ;;  %v815_v52 = vsub.f32 %v2045_v24, %v2112_v45  ;;  %v814_v60 = vsub.f32 %v2037_v15, %v2112_v45  ;;  %v849_v17 = vpop.permute.xlu1 %848  ;;  %v1836_v32 = vmov 3  }
 0x2ca   : > { %v817_v24 = vsub.f32 %v2058_v47, %v2112_v45  ;;  %v864_v18 = vmul.f32 %v849_v17, %v2134_v2  ;;  %v865_v1 = vmul.f32 %v849_v17, %v2137_v19  ;;  %v866_v27 = vmul.f32 %v849_v17, %v2140_v23  ;;  %1798 = vset.pattern.permute.xlu1 %v1836_v32 }
 0x2cb   : > { %v837_v54 = vmul.f32 %v2122_v53, %v816_v51  ;;  %v836_v55 = vmul.f32 %v2122_v53, %v815_v52  ;;  %v835_v31 = vmul.f32 %v2122_v53, %v814_v60  ;;  %1799 = vset.pattern.permute.xlu0 %v1836_v32 }
 0x2cc   : > { %v838_v5 = vmul.f32 %v2122_v53, %v817_v24 }
 0x2cd   : > { %1127 = vrot.lane.b32.xlu0 %v2150_v21, %s1829_s27  ;;  %1142 = vrot.lane.b32.xlu1 %v2156_v43, %s1826_s24  ;;  %v869_v22 = vmul.f32 %v853_v63, %v837_v54  ;;  %v868_v39 = vmul.f32 %v853_v63, %v836_v55  ;;  %v867_v4 = vmul.f32 %v853_v63, %v835_v31  ;;  %v881_v25 = vpop.permute.xlu1 %880 }
 0x2ce   : > { %v870_v16 = vmul.f32 %v853_v63, %v838_v5  ;;  %v896_v10 = vadd.f32 %v881_v25, %v864_v18  ;;  %v897_v14 = vadd.f32 %v881_v25, %v865_v1  ;;  %v898_v29 = vadd.f32 %v881_v25, %v866_v27 }
 0x2cf   : > { %v901_v61 = vadd.f32 %v885_v49, %v869_v22  ;;  %v900_v0 = vadd.f32 %v885_v49, %v868_v39  ;;  %v899_v13 = vadd.f32 %v885_v49, %v867_v4 }
 0x2d0   : > { %v902_v45 = vadd.f32 %v885_v49, %v870_v16  ;;  %v2257_v28 = vmax.f32 %v896_v10, 0.0  ;;  %v2259_v19 = vmax.f32 %v897_v14, 0.0  ;;  %v914_v23 = vmax.f32 %v898_v29, 0.0 }
 0x2d1   : > { %1148 = vrot.lane.b32.xlu0 %v926_v26, %s1826_s24  ;;  %1129 = vrot.lane.b32.xlu1 %v2148_v20, %s1829_s27  ;;  %v2226_v15 = vmax.f32 %v901_v61, 0.0  ;;  %v2228_v9 = vmax.f32 %v900_v0, 0.0  ;;  %v2234_v47 = vmax.f32 %v899_v13, 0.0 }
 0x2d2   : > { %v918_v53 = vmax.f32 %v902_v45, 0.0 }
 0x2d5   : > { %1110 = vrot.lane.b32.xlu0 %v2150_v21, %s1830_s28  ;;  %1125 = vrot.lane.b32.xlu1 %v2156_v43, %s1829_s27 }
 0x2d9   : > { %1131 = vrot.lane.b32.xlu0 %v926_v26, %s1829_s27  ;;  %1112 = vrot.lane.b32.xlu1 %v2148_v20, %s1830_s28 }
 0x2dd   : > { %1114 = vrot.lane.b32.xlu0 %v926_v26, %s1830_s28  ;;  %1108 = vrot.lane.b32.xlu1 %v2156_v43, %s1830_s28  ;;  %v863_v26 = vmul.f32 %v849_v17, %v2131_v62 }
 0x2df   : > { %v895_v2 = vadd.f32 %v881_v25, %v863_v26 }
 0x2e1   : > { %1088 = vrot.lane.b32.xlu0 %v2187_v46, %s1826_s24  ;;  %1086 = vrot.lane.b32.xlu1 %v2189_v34, %s1826_s24  ;;  %v2265_v62 = vmax.f32 %v895_v2, 0.0 }
 0x2e5   : > { %1069 = vrot.lane.b32.xlu0 %v2189_v34, %s1829_s27  ;;  %1084 = vrot.lane.b32.xlu1 %v2195_v3, %s1826_s24 }
 0x2e9   : > { %1090 = vrot.lane.b32.xlu0 %v922_v50, %s1826_s24  ;;  %1071 = vrot.lane.b32.xlu1 %v2187_v46, %s1829_s27 }
 0x2ed   : > { %1052 = vrot.lane.b32.xlu0 %v2189_v34, %s1830_s28  ;;  %1067 = vrot.lane.b32.xlu1 %v2195_v3, %s1829_s27 }
 0x2f1   : > { %1073 = vrot.lane.b32.xlu0 %v922_v50, %s1829_s27  ;;  %1054 = vrot.lane.b32.xlu1 %v2187_v46, %s1830_s28 }
 0x2f5   : > { %1056 = vrot.lane.b32.xlu0 %v922_v50, %s1830_s28  ;;  %1050 = vrot.lane.b32.xlu1 %v2195_v3, %s1830_s28 }
 0x2f9   : > { %1030 = vrot.lane.b32.xlu0 %v2226_v15, %s1826_s24  ;;  %1028 = vrot.lane.b32.xlu1 %v2228_v9, %s1826_s24 }
 0x2fd   : > { %1011 = vrot.lane.b32.xlu0 %v2228_v9, %s1829_s27  ;;  %1026 = vrot.lane.b32.xlu1 %v2234_v47, %s1826_s24 }
 0x301   : > { %1032 = vrot.lane.b32.xlu0 %v918_v53, %s1826_s24  ;;  %1013 = vrot.lane.b32.xlu1 %v2226_v15, %s1829_s27 }
 0x305   : > { %994 = vrot.lane.b32.xlu0 %v2228_v9, %s1830_s28  ;;  %1009 = vrot.lane.b32.xlu1 %v2234_v47, %s1829_s27 }
 0x309   : > { %1015 = vrot.lane.b32.xlu0 %v918_v53, %s1829_s27  ;;  %996 = vrot.lane.b32.xlu1 %v2226_v15, %s1830_s28 }
 0x30d   : > { %998 = vrot.lane.b32.xlu0 %v918_v53, %s1830_s28  ;;  %992 = vrot.lane.b32.xlu1 %v2234_v47, %s1830_s28 }
 0x311   : > { %972 = vrot.lane.b32.xlu0 %v2259_v19, %s1826_s24  ;;  %970 = vrot.lane.b32.xlu1 %v2257_v28, %s1826_s24 }
 0x315   : > { %953 = vrot.lane.b32.xlu0 %v2257_v28, %s1829_s27  ;;  %968 = vrot.lane.b32.xlu1 %v2265_v62, %s1826_s24 }
 0x319   : > { %974 = vrot.lane.b32.xlu0 %v914_v23, %s1826_s24  ;;  %955 = vrot.lane.b32.xlu1 %v2259_v19, %s1829_s27 }
 0x31d   : > { %936 = vrot.lane.b32.xlu0 %v2257_v28, %s1830_s28  ;;  %951 = vrot.lane.b32.xlu1 %v2265_v62, %s1829_s27 }
 0x321   : > { %957 = vrot.lane.b32.xlu0 %v914_v23, %s1829_s27  ;;  %938 = vrot.lane.b32.xlu1 %v2259_v19, %s1830_s28 }
 0x325   : > { %940 = vrot.lane.b32.xlu0 %v914_v23, %s1830_s28  ;;  %934 = vrot.lane.b32.xlu1 %v2265_v62, %s1830_s28 }
 0x329   : > { %1217 = vperm.xlu1 %1798, %v1900_v7   ;;  %1222 = vperm.xlu0 %1799, %v1905_v8  }
 0x32d   : > { %1227 = vperm.xlu1 %1798, %v1917_v11  }
 0x331   : > { %1232 = vperm.xlu1 %1798, %v2296_v35  }
 0x33b   : > { %v1147_v12 = vpop.permute.xlu0 %1146  ;;  %v1145_v56 = vpop.permute.xlu1 %1144 }
 0x33c   : > { %v1151_v36 = vsel %vm282_vm5, %v1145_v56, %v1147_v12 }
 0x33d   : > { %1235 = vmatprep.subr.mxu0 %v1151_v36 }
 0x33f   : > { %v1128_v37 = vpop.permute.xlu0 %1127  ;;  %v1143_v40 = vpop.permute.xlu1 %1142 }
 0x340   : > { %v1150_v7 = vsel %vm282_vm5, %v1143_v40, %v1145_v56 }
 0x341   : > { %1236 = vmatpush1.msra.mxu0 %v1150_v7 }
 0x343   : > { %v1149_v8 = vpop.permute.xlu0 %1148  ;;  %v1130_v41 = vpop.permute.xlu1 %1129 }
 0x344   : > { %v1134_v11 = vsel %vm262_vm8, %v1128_v37, %v1130_v41  ;;  %v1152_v42 = vsel %vm282_vm5, %v1147_v12, %v1149_v8 }
 0x345   : > { %1237 = vmatprep.subr.mxu0 %v1134_v11  ;;  %1707 = vmatprep.subr.mxu1 %v1152_v42 }
 0x346   : > { %1708 = vmatpush3.msra.mxu1 %v1152_v42 }
 0x347   : > { %v1111_v33 = vpop.permute.xlu0 %1110  ;;  %v1126_v44 = vpop.permute.xlu1 %1125 }
 0x348   : > { %v1133_v48 = vsel %vm262_vm8, %v1126_v44, %v1128_v37 }
 0x349   : > { %1238 = vmatpush1.msra.mxu0 %v1133_v48 }
 0x34b   : > { %v1132_v50 = vpop.permute.xlu0 %1131  ;;  %v1113_v51 = vpop.permute.xlu1 %1112 }
 0x34c   : > { %v1117_v52 = vsel %vm221_vm10, %v1111_v33, %v1113_v51  ;;  %v1135_v54 = vsel %vm262_vm8, %v1130_v41, %v1132_v50 }
 0x34d   : > { %1239 = vmatprep.subr.mxu0 %v1117_v52  ;;  %1709 = vmatprep.subr.mxu1 %v1135_v54 }
 0x34e   : > { %1710 = vmatpush3.msra.mxu1 %v1135_v54 }
 0x34f   : > { %v1115_v55 = vpop.permute.xlu0 %1114  ;;  %v1109_v63 = vpop.permute.xlu1 %1108 }
 0x350   : > { %v1116_v60 = vsel %vm221_vm10, %v1109_v63, %v1111_v33  ;;  %v1118_v22 = vsel %vm221_vm10, %v1113_v51, %v1115_v55 }
 0x351   : > { %1240 = vmatpush1.msra.mxu0 %v1116_v60  ;;  %1711 = vmatprep.subr.mxu1 %v1118_v22 }
 0x352   : > { %1241 = vmatprep.subr.mxu0 %v2150_v21  ;;  %1712 = vmatpush3.msra.mxu1 %v1118_v22 }
 0x353   : > { %v1089_v39 = vpop.permute.xlu0 %1088  ;;  %1242 = vmatpush1.msra.mxu0 %v2156_v43  ;;  %1713 = vmatprep.subr.mxu1 %v2148_v20  ;;  %v1087_v31 = vpop.permute.xlu1 %1086 }
 0x354   : > { %1714 = vmatpush3.msra.mxu1 %v2148_v20  ;;  %v1093_v24 = vsel %vm282_vm5, %v1087_v31, %v1089_v39 }
 0x355   : > { %1243 = vmatprep.subr.mxu0 %v1093_v24 }
 0x357   : > { %v1070_v49 = vpop.permute.xlu0 %1069  ;;  %v1085_v61 = vpop.permute.xlu1 %1084 }
 0x358   : > { %v1092_v0 = vsel %vm282_vm5, %v1085_v61, %v1087_v31 }
 0x359   : > { %1244 = vmatpush1.msra.mxu0 %v1092_v0 }
 0x35b   : > { %v1091_v4 = vpop.permute.xlu0 %1090  ;;  %v1072_v5 = vpop.permute.xlu1 %1071 }
 0x35c   : > { %v1076_v21 = vsel %vm262_vm8, %v1070_v49, %v1072_v5  ;;  %v1094_v13 = vsel %vm282_vm5, %v1089_v39, %v1091_v4 }
 0x35d   : > { %1245 = vmatprep.subr.mxu0 %v1076_v21  ;;  %1715 = vmatprep.subr.mxu1 %v1094_v13 }
 0x35e   : > { %1716 = vmatpush3.msra.mxu1 %v1094_v13  ;;  %v1160_v13 = vld [vmem:[%s2459_s2 + $0x8] sm:$0xff] }
 0x35f   : > { %v1053_v43 = vpop.permute.xlu0 %1052  ;;  %v1068_v16 = vpop.permute.xlu1 %1067 }
 0x360   : > { %v1075_v20 = vsel %vm262_vm8, %v1068_v16, %v1070_v49 }
 0x361   : > { %1246 = vmatpush1.msra.mxu0 %v1075_v20 }
 0x363   : > { %v1074_v45 = vpop.permute.xlu0 %1073  ;;  %v1055_v53 = vpop.permute.xlu1 %1054 }
 0x364   : > { %v1059_v17 = vsel %vm221_vm10, %v1053_v43, %v1055_v53  ;;  %v1077_v18 = vsel %vm262_vm8, %v1072_v5, %v1074_v45 }
 0x365   : > { %1247 = vmatprep.subr.mxu0 %v1059_v17  ;;  %1717 = vmatprep.subr.mxu1 %v1077_v18  ;;  %v1682_v17 = vsel %vm1410_vm14, 1.0, %v1831_v6 }
 0x366   : > { %1718 = vmatpush3.msra.mxu1 %v1077_v18 }
 0x367   : > { %v1057_v1 = vpop.permute.xlu0 %1056  ;;  %v1051_v25 = vpop.permute.xlu1 %1050 }
 0x368   : > { %v1058_v26 = vsel %vm221_vm10, %v1051_v25, %v1053_v43  ;;  %v1060_v10 = vsel %vm221_vm10, %v1055_v53, %v1057_v1  ;;  %v1161_v43 = vld [vmem:[%s2459_s2 + $0x10] sm:$0xff] }
 0x369   : > { %1248 = vmatpush1.msra.mxu0 %v1058_v26  ;;  %1719 = vmatprep.subr.mxu1 %v1060_v10 }
 0x36a   : > { %1249 = vmatprep.subr.mxu0 %v2189_v34  ;;  %1720 = vmatpush3.msra.mxu1 %v1060_v10 }
 0x36b   : > { %v1031_v14 = vpop.permute.xlu0 %1030  ;;  %1250 = vmatpush1.msra.mxu0 %v2195_v3  ;;  %1721 = vmatprep.subr.mxu1 %v2187_v46  ;;  %v1029_v27 = vpop.permute.xlu1 %1028 }
 0x36c   : > { %1722 = vmatpush3.msra.mxu1 %v2187_v46  ;;  %v1035_v2 = vsel %vm282_vm5, %v1029_v27, %v1031_v14 }
 0x36d   : > { %1251 = vmatprep.subr.mxu0 %v1035_v2 }
 0x36f   : > { %v1012_v29 = vpop.permute.xlu0 %1011  ;;  %v1027_v23 = vpop.permute.xlu1 %1026 }
 0x370   : > { %v1034_v32 = vsel %vm282_vm5, %v1027_v23, %v1029_v27 }
 0x371   : > { %1252 = vmatpush1.msra.mxu0 %v1034_v32 }
 0x373   : > { %v1033_v12 = vpop.permute.xlu0 %1032  ;;  %v1014_v56 = vpop.permute.xlu1 %1013 }
 0x374   : > { %v1018_v34 = vsel %vm262_vm8, %v1012_v29, %v1014_v56  ;;  %v1036_v36 = vsel %vm282_vm5, %v1031_v14, %v1033_v12 }
 0x375   : > { %1253 = vmatprep.subr.mxu0 %v1018_v34  ;;  %1723 = vmatprep.subr.mxu1 %v1036_v36 }
 0x376   : > { %1724 = vmatpush3.msra.mxu1 %v1036_v36 }
 0x377   : > { %v995_v3 = vpop.permute.xlu0 %994  ;;  %v1010_v37 = vpop.permute.xlu1 %1009 }
 0x378   : > { %v1017_v46 = vsel %vm262_vm8, %v1010_v37, %v1012_v29 }
 0x379   : > { %1254 = vmatpush1.msra.mxu0 %v1017_v46 }
 0x37b   : > { %v1016_v40 = vpop.permute.xlu0 %1015  ;;  %v997_v7 = vpop.permute.xlu1 %996 }
 0x37c   : > { %v1001_v8 = vsel %vm221_vm10, %v995_v3, %v997_v7  ;;  %v1019_v41 = vsel %vm262_vm8, %v1014_v56, %v1016_v40 }
 0x37d   : > { %1255 = vmatprep.subr.mxu0 %v1001_v8  ;;  %1725 = vmatprep.subr.mxu1 %v1019_v41 }
 0x37e   : > { %1726 = vmatpush3.msra.mxu1 %v1019_v41 }
 0x37f   : > { %v999_v11 = vpop.permute.xlu0 %998  ;;  %v993_v42 = vpop.permute.xlu1 %992 }
 0x380   : > { %v1000_v33 = vsel %vm221_vm10, %v993_v42, %v995_v3  ;;  %v1002_v44 = vsel %vm221_vm10, %v997_v7, %v999_v11 }
 0x381   : > { %1256 = vmatpush1.msra.mxu0 %v1000_v33  ;;  %1727 = vmatprep.subr.mxu1 %v1002_v44 }
 0x382   : > { %1257 = vmatprep.subr.mxu0 %v2228_v9  ;;  %1728 = vmatpush3.msra.mxu1 %v1002_v44 }
 0x383   : > { %v973_v48 = vpop.permute.xlu0 %972  ;;  %1258 = vmatpush1.msra.mxu0 %v2234_v47  ;;  %1729 = vmatprep.subr.mxu1 %v2226_v15  ;;  %v971_v50 = vpop.permute.xlu1 %970 }
 0x384   : > { %1730 = vmatpush3.msra.mxu1 %v2226_v15  ;;  %v977_v51 = vsel %vm282_vm5, %v971_v50, %v973_v48 }
 0x385   : > { %1259 = vmatprep.subr.mxu0 %v977_v51 }
 0x387   : > { %v954_v52 = vpop.permute.xlu0 %953  ;;  %v969_v54 = vpop.permute.xlu1 %968 }
 0x388   : > { %v976_v55 = vsel %vm282_vm5, %v969_v54, %v971_v50 }
 0x389   : > { %1260 = vmatpush1.msra.mxu0 %v976_v55 }
 0x38b   : > { %v975_v63 = vpop.permute.xlu0 %974  ;;  %v956_v60 = vpop.permute.xlu1 %955 }
 0x38c   : > { %v960_v9 = vsel %vm262_vm8, %v954_v52, %v956_v60  ;;  %v978_v22 = vsel %vm282_vm5, %v973_v48, %v975_v63  ;;  %vm1409_vm5 = vcmp.lt.s32.totalorder %v2010_v57, 15 }
 0x38d   : > { %1261 = vmatprep.subr.mxu0 %v960_v9  ;;  %1731 = vmatprep.subr.mxu1 %v978_v22  ;;  %v1681_v16 = vsel %vm1409_vm5, 1.0, %v1831_v6 }
 0x38e   : > { %1732 = vmatpush3.msra.mxu1 %v978_v22 }
 0x38f   : > { %v937_v47 = vpop.permute.xlu0 %936  ;;  %v952_v39 = vpop.permute.xlu1 %951 }
 0x390   : > { %v959_v15 = vsel %vm262_vm8, %v952_v39, %v954_v52 }
 0x391   : > { %1262 = vmatpush1.msra.mxu0 %v959_v15 }
 0x393   : > { %v958_v31 = vpop.permute.xlu0 %957  ;;  %v939_v24 = vpop.permute.xlu1 %938 }
 0x394   : > { %v943_v49 = vsel %vm221_vm10, %v937_v47, %v939_v24  ;;  %v961_v61 = vsel %vm262_vm8, %v956_v60, %v958_v31  ;;  %vm1411_vm8 = vcmp.lt.s32.totalorder %v2015_v59, 15 }
 0x395   : > { %1263 = vmatprep.subr.mxu0 %v943_v49  ;;  %1733 = vmatprep.subr.mxu1 %v961_v61 }
 0x396   : > { %1734 = vmatpush3.msra.mxu1 %v961_v61 }
 0x397   : > { %v941_v0 = vpop.permute.xlu0 %940  ;;  %v935_v4 = vpop.permute.xlu1 %934 }
 0x398   : > { %v942_v5 = vsel %vm221_vm10, %v935_v4, %v937_v47  ;;  %v944_v21 = vsel %vm221_vm10, %v939_v24, %v941_v0  ;;  %vm1414_vm10 = vcmp.lt.s32.totalorder %v1994_v38, 270 }
 0x399   : > { %1264 = vmatpush1.msra.mxu0 %v942_v5  ;;  %1735 = vmatprep.subr.mxu1 %v944_v21  ;;  %vm1417_vm15 = vmand %vm1411_vm8, %vm1414_vm10 }
 0x39a   : > { %1265 = vmatprep.subr.mxu0 %v2257_v28  ;;  %1736 = vmatpush3.msra.mxu1 %v944_v21  ;;  %v1162_v28 = vld [vmem:[%s2459_s2 + $0x18] sm:$0xff]  ;;  %v1683_v57 = vsel %vm1417_vm15, 1.0, %v1831_v6 }
 0x39b   : > { %1266 = vmatpush1.msra.mxu0 %v2265_v62  ;;  %1737 = vmatprep.subr.mxu1 %v2259_v19  ;;  %v1837_v62 = vmov 4  }
 0x39c   : > { %1300 = vmatmul.mubr.f32.vlgmr.msra.gmra.mxu0 %v2277_v30  ;;  %1738 = vmatpush3.msra.mxu1 %v2259_v19 }
 0x39d   : > { %1740 = vmatmul.mubr.f32.vlgmr.msra.gmra.mxu1 %v1160_v13  ;;  %1305 = vmatprep.mubr.f32.mxu0 %v1831_v6 }
 0x39e   : > { %1742 = vmatprep.mubr.f32.mxu1 %v1161_v43  ;;  %1801 = vset.pattern.permute.xlu1 %v1837_v62 }
 0x39f   : > { %1800 = vset.pattern.permute.xlu0 %v1837_v62 }
 0x3a0   : > { %1306 = vmatmul.mubr.f32.gmra.mxu0 %v1160_v13 }
 0x3a1   : > { %1743 = vmatmul.mubr.f32.gmra.mxu1 %v1162_v28  ;;  %1311 = vmatprep.mubr.f32.mxu0 %v1831_v6 }
 0x3a4   : > { %1312 = vmatmul.mubr.f32.gmra.mxu0 %v1161_v43  ;;  %v1218_v19 = vpop.permute.xlu1 %1217  ;;  %v1223_v59 = vpop.permute.xlu0 %1222 }
 0x3a5   : > { %1317 = vmatprep.mubr.f32.mxu0 %v1831_v6 }
 0x3a8   : > { %1318 = vmatmul.mubr.f32.gmra.mxu0 %v1162_v28  ;;  %v1228_v34 = vpop.permute.xlu1 %1227 }
 0x3ac   : > { %v1233_v9 = vpop.permute.xlu1 %1232 }
 0x45c   : > { %v1301_v30 = vpop.f32.mrf.mxu0 }
 0x45d   : > { %v2369_v20 = vadd.f32 %v1301_v30, %v1218_v19  ;;  %v1741_v45 = vpop.f32.mrf.mxu1 }
 0x45e   : > { %v1303_v53 = vpop.f32.mrf.mxu0  ;;  %v2381_v2 = vadd.f32 %v1741_v45, %v1223_v59 }
 0x45f   : > { %v1424_v18 = vmul.f32 %v1681_v16, %v2369_v20  ;;  %v2374_v1 = vadd.f32 %v1303_v53, %v1218_v19  ;;  %v1390_v38 = vpop.f32.mrf.mxu1 }
 0x460   : > { %v2376_v58 = vadd.f32 %v1390_v38, %v1218_v19  ;;  %v1307_v25 = vpop.f32.mrf.mxu0  ;;  %v1429_v41 = vmul.f32 %v1683_v57, %v2381_v2 }
 0x461   : > { %v1425_v26 = vmul.f32 %v1682_v17, %v2374_v1  ;;  %v2379_v10 = vadd.f32 %v1307_v25, %v1223_v59  ;;  %v1744_v14 = vpop.f32.mrf.mxu1  ;;  %v1457_v27 = vmul.f32 %v1424_v18, %v1424_v18 }
 0x462   : > { %v1426_v29 = vmul.f32 %v1683_v57, %v2376_v58  ;;  %v1309_v23 = vpop.f32.mrf.mxu0  ;;  %v1462_v60 = vmul.f32 %v1429_v41, %v1429_v41  ;;  %v2402_v5 = vadd.f32 %v1744_v14, %v1233_v9 }
 0x463   : > { %v1436_v32 = vadd.f32 %v1425_v26, %v1424_v18  ;;  %v1458_v6 = vmul.f32 %v1425_v26, %v1425_v26  ;;  %v1427_v12 = vmul.f32 %v1681_v16, %v2379_v10  ;;  %v2385_v56 = vadd.f32 %v1309_v23, %v1223_v59  ;;  %v1400_v8 = vpop.f32.mrf.mxu1 }
 0x464   : > { %v1459_v36 = vmul.f32 %v1426_v29, %v1426_v29  ;;  %v1313_v3 = vpop.f32.mrf.mxu0  ;;  %v2393_v50 = vadd.f32 %v1400_v8, %v1228_v34  ;;  %v1435_v53 = vmul.f32 %v1683_v57, %v2402_v5 }
 0x465   : > { %v1469_v37 = vadd.f32 %v1458_v6, %v1457_v27  ;;  %v1437_v46 = vadd.f32 %v1436_v32, %v1426_v29  ;;  %v1460_v40 = vmul.f32 %v1427_v12, %v1427_v12  ;;  %v1428_v7 = vmul.f32 %v1682_v17, %v2385_v56 }
 0x466   : > { %v2389_v11 = vadd.f32 %v1313_v3, %v1228_v34  ;;  %v1315_v42 = vpop.f32.mrf.mxu0  ;;  %v1432_v24 = vmul.f32 %v1683_v57, %v2393_v50  ;;  %v1468_v14 = vmul.f32 %v1435_v53, %v1435_v53  ;;  %v1814_v57 = vld [vmem:[%s2460_s3 + $0x10] sm:$0xff]  ;;  %v1838_v6 = vmov 5  }
 0x467   : > { %v1470_v33 = vadd.f32 %v1469_v37, %v1459_v36  ;;  %v1438_v44 = vadd.f32 %v1437_v46, %v1427_v12  ;;  %v2391_v48 = vadd.f32 %v1315_v42, %v1228_v34  ;;  %v1461_v55 = vmul.f32 %v1428_v7, %v1428_v7 }
 0x468   : > { %v1319_v51 = vpop.f32.mrf.mxu0  ;;  %v1430_v63 = vmul.f32 %v1681_v16, %v2389_v11  ;;  %v1465_v62 = vmul.f32 %v1432_v24, %v1432_v24 }
 0x469   : > { %v1471_v52 = vadd.f32 %v1470_v33, %v1460_v40  ;;  %v1439_v54 = vadd.f32 %v1438_v44, %v1428_v7  ;;  %v1431_v15 = vmul.f32 %v1682_v17, %v2391_v48  ;;  %v2397_v31 = vadd.f32 %v1319_v51, %v1233_v9 }
 0x46a   : > { %v1321_v22 = vpop.f32.mrf.mxu0  ;;  %v1463_v61 = vmul.f32 %v1430_v63, %v1430_v63 }
 0x46b   : > { %v1472_v47 = vadd.f32 %v1471_v52, %v1461_v55  ;;  %v1440_v39 = vadd.f32 %v1439_v54, %v1429_v41  ;;  %v2400_v4 = vadd.f32 %v1321_v22, %v1233_v9  ;;  %v1464_v43 = vmul.f32 %v1431_v15, %v1431_v15 }
 0x46c   : > { %v1433_v28 = vmul.f32 %v1681_v16, %v2397_v31  ;;  %v1812_v16 = vld [vmem:[%s2460_s3 + $0x8] sm:$0xff] }
 0x46d   : > { %v1441_v49 = vadd.f32 %v1440_v39, %v1430_v63  ;;  %v1473_v0 = vadd.f32 %v1472_v47, %v1462_v60  ;;  %v1434_v45 = vmul.f32 %v1682_v17, %v2400_v4  ;;  %v1813_v17 = vld [vmem:[%s2460_s3] sm:$0xff] }
 0x46e   : > { %v1466_v59 = vmul.f32 %v1433_v28, %v1433_v28 }
 0x46f   : > { %v1474_v21 = vadd.f32 %v1473_v0, %v1463_v61  ;;  %v1442_v13 = vadd.f32 %v1441_v49, %v1431_v15  ;;  %v1467_v26 = vmul.f32 %v1434_v45, %v1434_v45 }
 0x471   : > { %v1475_v19 = vadd.f32 %v1474_v21, %v1464_v43  ;;  %v1443_v30 = vadd.f32 %v1442_v13, %v1432_v24 }
 0x473   : > { %v1444_v18 = vadd.f32 %v1443_v30, %v1433_v28  ;;  %v1476_v38 = vadd.f32 %v1475_v19, %v1465_v62 }
 0x475   : > { %v1477_v25 = vadd.f32 %v1476_v38, %v1466_v59  ;;  %v1445_v27 = vadd.f32 %v1444_v18, %v1434_v45 }
 0x477   : > { %v1446_v29 = vadd.f32 %v1445_v27, %v1435_v53  ;;  %v1478_v23 = vadd.f32 %v1477_v25, %v1467_v26 }
 0x479   : > { %1447 = vadd.xlane.f32.xlu0 %v1446_v29  ;;  %v1479_v32 = vadd.f32 %v1478_v23, %v1468_v14 }
 0x47b   : > { %1480 = vadd.xlane.f32.xlu1 %v1479_v32 }
 0x48c   : > { %1528 = vperm.xlu1 %1801, %v1812_v16  }
 0x48f   : > { %1524 = vperm.xlu0 %1800, %v1813_v17  }
 0x490   : > { %1532 = vperm.xlu1 %1801, %v1814_v57  }
 0x493   : > { %1803 = vset.pattern.permute.xlu0 %v1838_v6 }
 0x494   : > { %1536 = vperm.xlu1 %1801, %v2296_v35   ;;  %1564 = vperm.xlu0 %1803, %v2296_v35  }
 0x498   : > { %1802 = vset.pattern.permute.xlu1 %v1838_v6 }
 0x499   : > { %1552 = vperm.xlu1 %1802, %v1813_v17  }
 0x49d   : > { %1556 = vperm.xlu1 %1802, %v1812_v16  }
 0x4a1   : > { %1560 = vperm.xlu1 %1802, %v1814_v57  }
 0x502   : > { %v1448_v12 = vpop.xlane.xlu0 %1447 }
 0x503   : > { %v1449_v34 = vrot.slane %v1448_v12, 4 }
 0x504   : > { %v1481_v36 = vpop.xlane.xlu1 %1480 }
 0x505   : > { %v1450_v3 = vadd.f32 %v1449_v34, %v1448_v12  ;;  %v1482_v37 = vrot.slane %v1481_v36, 4 }
 0x507   : > { %v1451_v46 = vrot.slane %v1450_v3, 2  ;;  %v1483_v40 = vadd.f32 %v1482_v37, %v1481_v36 }
 0x508   : > { %v1529_v54 = vpop.permute.xlu1 %1528 }
 0x509   : > { %v1484_v7 = vrot.slane %v1483_v40, 2  ;;  %v1452_v8 = vadd.f32 %v1451_v46, %v1450_v3 }
 0x50a   : > { %v1525_v18 = vpop.permute.xlu0 %1524 }
 0x50b   : > { %v1453_v41 = vrot.slane %v1452_v8, 1  ;;  %v1485_v42 = vadd.f32 %v1484_v7, %v1483_v40 }
 0x50c   : > { %v1533_v55 = vpop.permute.xlu1 %1532 }
 0x50d   : > { %v1454_v33 = vadd.f32 %v1453_v41, %v1452_v8  ;;  %v1486_v44 = vrot.slane %v1485_v42, 1 }
 0x50f   : > { %1758 = vpush %v1454_v33  ;;  %v1487_v51 = vadd.f32 %v1486_v44, %v1485_v42  ;;  %v1565_v33 = vpop.permute.xlu0 %1564 }
 0x510   : > { %v2419_v63 = vpop.permute.xlu1 %1536 }
 0x511   : > { %1760 = vpush %v1487_v51 }
 0x514   : > { %v1553_v60 = vpop.permute.xlu1 %1552 }
 0x518   : > { %v1557_v47 = vpop.permute.xlu1 %1556 }
 0x51c   : > { %v1561_v59 = vpop.permute.xlu1 %1560 }
 0x540   : > { %s1759_s23 = spop %1758 }
 0x541   : > { %s1456_s25 = smul.f32 0.00013888889, %s1759_s23 }
 0x542   : > { %s1761_s26 = spop %1760 }
 0x543   : > { %s1490_s29 = smul.f32 %s1456_s25, %s1456_s25  ;;  %v1493_v9 = vstv %s1456_s25 }
 0x544   : > { %s1489_s5 = smul.f32 0.00013888889, %s1761_s26  ;;  %v1497_v22 = vsub.f32 %v2379_v10, %v1493_v9  ;;  %v1498_v39 = vsub.f32 %v2385_v56, %v1493_v9  ;;  %v1499_v15 = vsub.f32 %v2381_v2, %v1493_v9  ;;  %v1500_v24 = vsub.f32 %v2389_v11, %v1493_v9 }
 0x545   : > { %v1501_v49 = vsub.f32 %v2391_v48, %v1493_v9  ;;  %v1502_v61 = vsub.f32 %v2393_v50, %v1493_v9  ;;  %v1494_v0 = vsub.f32 %v2369_v20, %v1493_v9  ;;  %v1495_v21 = vsub.f32 %v2374_v1, %v1493_v9 }
 0x546   : > { %s1491_s6 = ssub.f32 %s1489_s5, %s1490_s29  ;;  %v1496_v13 = vsub.f32 %v2376_v58, %v1493_v9  ;;  %v1503_v43 = vsub.f32 %v2397_v31, %v1493_v9  ;;  %v1504_v56 = vsub.f32 %v2400_v4, %v1493_v9  ;;  %v1505_v2 = vsub.f32 %v2402_v5, %v1493_v9 }
 0x548   : > { %s1492_s7 = smax.f32 %s1835_s30, %s1491_s6 }
 0x549   : > { %s1506_s8 = sadd.f32 1e-05, %s1492_s7 }
 0x54b   : > { %v1507_v35 = vstv %s1506_s8 }
 0x54c   : > { %1810 = vrsqrt.f32 %v1507_v35 }
 0x559   : > { %v1811_v52 = vpop.eup %1810 }
 0x55a   : > { %1762 = vpush %v1811_v52 }
 0x58b   : > { %s1763_s30 = spop %1762 }
 0x58c   : > { %v1510_v10 = vstv %s1763_s30 }
 0x58d   : > { %v1514_v28 = vmul.f32 %v1510_v10, %v1497_v22  ;;  %v1515_v11 = vmul.f32 %v1510_v10, %v1498_v39  ;;  %v1516_v62 = vmul.f32 %v1510_v10, %v1499_v15  ;;  %v1517_v48 = vmul.f32 %v1510_v10, %v1500_v24 }
 0x58e   : > { %v1518_v50 = vmul.f32 %v1510_v10, %v1501_v49  ;;  %v1519_v19 = vmul.f32 %v1510_v10, %v1502_v61  ;;  %v1511_v30 = vmul.f32 %v1510_v10, %v1494_v0  ;;  %v1512_v20 = vmul.f32 %v1510_v10, %v1495_v21 }
 0x58f   : > { %v1542_v45 = vmul.f32 %v1529_v54, %v1514_v28  ;;  %v1543_v1 = vmul.f32 %v1529_v54, %v1515_v11  ;;  %v1544_v53 = vmul.f32 %v1529_v54, %v1516_v62  ;;  %v1545_v58 = vmul.f32 %v1533_v55, %v1517_v48 }
 0x590   : > { %v1546_v31 = vmul.f32 %v1533_v55, %v1518_v50  ;;  %v1547_v38 = vmul.f32 %v1533_v55, %v1519_v19  ;;  %v1513_v4 = vmul.f32 %v1510_v10, %v1496_v13  ;;  %v1539_v25 = vmul.f32 %v1525_v18, %v1511_v30 }
 0x591   : > { %v1570_v5 = vadd.f32 %v1557_v47, %v1542_v45  ;;  %v1571_v26 = vadd.f32 %v1557_v47, %v1543_v1  ;;  %v1572_v27 = vadd.f32 %v1557_v47, %v1544_v53  ;;  %v1573_v14 = vadd.f32 %v1561_v59, %v1545_v58 }
 0x592   : > { %v1574_v29 = vadd.f32 %v1561_v59, %v1546_v31  ;;  %v1575_v23 = vadd.f32 %v1561_v59, %v1547_v38  ;;  %v1540_v32 = vmul.f32 %v1525_v18, %v1512_v20  ;;  %v1541_v16 = vmul.f32 %v1525_v18, %v1513_v4 }
 0x593   : > { %v1582_v17 = vmax.f32 %v1570_v5, 0.0  ;;  %v1583_v57 = vmax.f32 %v1571_v26, 0.0  ;;  %v1584_v6 = vmax.f32 %v1572_v27, 0.0  ;;  %v1585_v12 = vmax.f32 %v1573_v14, 0.0 }
 0x594   : > { %v1586_v34 = vmax.f32 %v1574_v29, 0.0  ;;  %v1587_v36 = vmax.f32 %v1575_v23, 0.0  ;;  %v1567_v3 = vadd.f32 %v1553_v60, %v1539_v25  ;;  %v1568_v37 = vadd.f32 %v1553_v60, %v1540_v32 }
 0x595   : > { %1594 = vst [vmem:[%s2437_s10 + $0x18] sm:$0xff] %v1582_v17  ;;  %1595 = vst [vmem:[%s2437_s10 + $0x20] sm:$0xff] %v1583_v57  ;;  %v1569_v46 = vadd.f32 %v1553_v60, %v1541_v16  ;;  %v1520_v40 = vmul.f32 %v1510_v10, %v1503_v43  ;;  %v1521_v7 = vmul.f32 %v1510_v10, %v1504_v56 }
 0x596   : > { %1596 = vst [vmem:[%s2437_s10 + $0x28] sm:$0xff] %v1584_v6  ;;  %1597 = vst [vmem:[%s2437_s10 + $0x30] sm:$0xff] %v1585_v12  ;;  %v1522_v8 = vmul.f32 %v1510_v10, %v1505_v2  ;;  %v1579_v41 = vmax.f32 %v1567_v3, 0.0  ;;  %v1580_v42 = vmax.f32 %v1568_v37, 0.0 }
 0x597   : > { %1598 = vst [vmem:[%s2437_s10 + $0x38] sm:$0xff] %v1586_v34  ;;  %1599 = vst [vmem:[%s2437_s10 + $0x40] sm:$0xff] %v1587_v36  ;;  %v1581_v44 = vmax.f32 %v1569_v46, 0.0  ;;  %v1548_v51 = vmul.f32 %v2419_v63, %v1520_v40  ;;  %v1549_v35 = vmul.f32 %v2419_v63, %v1521_v7 }
 0x598   : > { %v1550_v52 = vmul.f32 %v2419_v63, %v1522_v8  ;;  %1591 = vst [vmem:[%s2437_s10] sm:$0xff] %v1579_v41  ;;  %1592 = vst [vmem:[%s2437_s10 + $0x8] sm:$0xff] %v1580_v42 }
 0x599   : > { %1593 = vst [vmem:[%s2437_s10 + $0x10] sm:$0xff] %v1581_v44  ;;  %v1576_v54 = vadd.f32 %v1565_v33, %v1548_v51  ;;  %v1577_v55 = vadd.f32 %v1565_v33, %v1549_v35 }
 0x59a   : > { %v1578_v60 = vadd.f32 %v1565_v33, %v1550_v52 }
 0x59b   : > { %v1588_v9 = vmax.f32 %v1576_v54, 0.0  ;;  %v1589_v22 = vmax.f32 %v1577_v55, 0.0 }
 0x59c   : > { %v1590_v47 = vmax.f32 %v1578_v60, 0.0 }
 0x59d   : > { %1600 = vst [vmem:[%s2437_s10 + $0x48] sm:$0xff] %v1588_v9  ;;  %1601 = vst [vmem:[%s2437_s10 + $0x50] sm:$0xff] %v1589_v22 }
 0x59e   : > { %1602 = vst [vmem:[%s2437_s10 + $0x58] sm:$0xff] %v1590_v47 }
 0x59f PF: > { %s14_s15 = sadd.s32 1, %s1821_s15  }
 0x5a0   : > { %p11_p4 = scmp.ge.s32.totalorder %s14_s15, 4  }
 0x5a2   :  { %13 = sbr.rel (!%p11_p4) target bundleno = 1 (0x1), region = 66 }

</bundles_post_ra>
